<compile_context>
chip_gen: v7x
topology: tpu7x:2x2x1
jax: 0.10.0
libtpu: 0.0.40
codegen_flags: <defaults>
</compile_context>

<pallas_src>
import functools

import jax
import jax.numpy as jnp
from jax.experimental import pallas as pl
from jax.experimental.pallas import tpu as pltpu


# ---------------------------------------------------------------------------
# Pallas kernels
# ---------------------------------------------------------------------------
def _full_spec(shape):
    # single-block spec (block == full array)
    return pl.BlockSpec(shape, lambda *_: (0,) * len(shape))


def _batched_gcn_encoder_kernel(*refs, num_layers):
    """One grid step == one graph.  All GCN layers fused; intermediates stay on-chip.

    H_{l+1} = relu( A_hat @ (H_l @ W_l) + b_l )   (encoding=True: act on every layer)
    """
    a_ref, x_ref = refs[0], refs[1]
    o_ref = refs[2 + 2 * num_layers]
    a = a_ref[0]                     # (N, N)  bf16
    h = x_ref[0]                     # (N, F)  bf16
    out_f32 = None
    for l in range(num_layers):
        w = refs[2 + 2 * l][...]     # (d_in, H) bf16
        b = refs[3 + 2 * l][...]     # (1, H)    f32
        xw = jnp.dot(h, w, preferred_element_type=jnp.float32)
        agg = jnp.dot(a, xw.astype(jnp.bfloat16), preferred_element_type=jnp.float32)
        out_f32 = jnp.maximum(agg + b, 0.0)
        h = out_f32.astype(jnp.bfloat16)
    o_ref[0] = out_f32.astype(o_ref.dtype)


def batched_gcn_encoder(a_stack, x_stack, enc_params):
    """a_stack: (G, N, N) bf16, x_stack: (G, N, F) bf16 -> (G, N, H) f32."""
    g, n, _ = a_stack.shape
    f = x_stack.shape[-1]
    num_layers = len(enc_params)
    h = enc_params[-1][0].shape[1]

    in_specs = [
        pl.BlockSpec((1, n, n), lambda i: (i, 0, 0)),
        pl.BlockSpec((1, n, f), lambda i: (i, 0, 0)),
    ]
    args = [a_stack, x_stack]
    for (w, b) in enc_params:
        in_specs.append(pl.BlockSpec(w.shape, lambda i: (0, 0)))
        in_specs.append(pl.BlockSpec(b.shape, lambda i: (0, 0)))
        args.append(w.astype(jnp.bfloat16))
        args.append(b)

    kernel = functools.partial(_batched_gcn_encoder_kernel, num_layers=num_layers)
    return pl.pallas_call(
        kernel,
        out_shape=jax.ShapeDtypeStruct((g, n, h), jnp.float32),
        grid=(g,),
        in_specs=in_specs,
        out_specs=pl.BlockSpec((1, n, h), lambda i: (i, 0, 0)),
        compiler_params=pltpu.CompilerParams(dimension_semantics=("parallel",)),
    )(*args)


def _decoder_kernel(z_ref, w1_ref, w2_ref, b2_ref, o_ref):
    # rep   = z @ W_e2d                (encoder_to_decoder, bias=False)
    # recon = rep @ W_dec + b_dec      (decoder_type == 'linear')
    z = z_ref[...].astype(jnp.bfloat16)
    rep = jnp.dot(z, w1_ref[...], preferred_element_type=jnp.float32)
    recon = jnp.dot(rep.astype(jnp.bfloat16), w2_ref[...],
                    preferred_element_type=jnp.float32)
    o_ref[...] = (recon + b2_ref[...]).astype(o_ref.dtype)


def fused_decoder(z3, w_e2d, w_dec, b_dec):
    n = z3.shape[0]
    f = w_dec.shape[1]
    return pl.pallas_call(
        _decoder_kernel,
        out_shape=jax.ShapeDtypeStruct((n, f), jnp.float32),
        grid=(1,),
        in_specs=[_full_spec(z3.shape), _full_spec(w_e2d.shape),
                  _full_spec(w_dec.shape), _full_spec(b_dec.shape)],
        out_specs=_full_spec((n, f)),
    )(z3, w_e2d.astype(jnp.bfloat16), w_dec.astype(jnp.bfloat16), b_dec)


def _sce_loss_kernel(x_ref, y_ref, o_ref, *, alpha):
    # sce_loss: mean( (1 - cos(x_i, y_i))^alpha )
    x = x_ref[...].astype(jnp.float32)
    y = y_ref[...].astype(jnp.float32)
    xn = x * jax.lax.rsqrt(jnp.sum(x * x, axis=-1, keepdims=True) + 1e-12)
    yn = y * jax.lax.rsqrt(jnp.sum(y * y, axis=-1, keepdims=True) + 1e-12)
    cos = jnp.sum(xn * yn, axis=-1, keepdims=True)          # [M, 1]
    l = 1.0 - cos
    if float(alpha).is_integer():
        loss = l ** int(alpha)
    else:
        loss = jnp.power(jnp.maximum(l, 0.0), alpha)
    o_ref[...] = jnp.mean(loss, axis=0, keepdims=True)       # [1, 1]


def sce_loss(x_rec, x_init, alpha):
    kernel = functools.partial(_sce_loss_kernel, alpha=alpha)
    out = pl.pallas_call(
        kernel,
        out_shape=jax.ShapeDtypeStruct((1, 1), jnp.float32),
        grid=(1,),
        in_specs=[_full_spec(x_rec.shape), _full_spec(x_init.shape)],
        out_specs=_full_spec((1, 1)),
    )(x_rec, x_init)
    return out[0, 0]


def _contrastive_kernel(z1_ref, z2_ref, z3_ref, o_ref, *, tau1, tau2):
    z1 = z1_ref[...]                                         # [N1, D] f32
    z2 = z2_ref[...]                                         # [N,  D] f32
    z3 = z3_ref[...]                                         # [N,  D] f32

    # pre-normalize (rsqrt -> EUP slot) and fold 1/tau into the column operands;
    # this removes the rank-1 outer-product denominators and full-matrix divides.
    z1n = z1 * jax.lax.rsqrt(jnp.sum(z1 * z1, axis=-1, keepdims=True) + 1e-12)
    z2n = z2 * jax.lax.rsqrt(jnp.sum(z2 * z2, axis=-1, keepdims=True) + 1e-12)
    z3n = z3 * jax.lax.rsqrt(jnp.sum(z3 * z3, axis=-1, keepdims=True) + 1e-12)
    z2s = z2n * (1.0 / tau1)
    z3s = z3n * (1.0 / tau2)

    n1 = z1.shape[0]
    # positive pairs = diag(sim_intra): row-wise dot, no N1 x N eye-mask temporary.
    pos = jnp.exp(jnp.sum(z1n * z2s[:n1, :], axis=-1, keepdims=True))   # [N1, 1]

    dims = (((1,), (1,)), ((), ()))                                     # 'ik,jk->ij'
    sim_intra = jnp.exp(jax.lax.dot_general(
        z1n.astype(jnp.bfloat16), z2s.astype(jnp.bfloat16), dims,
        preferred_element_type=jnp.float32))
    sim_inter = jnp.exp(jax.lax.dot_general(
        z1n.astype(jnp.bfloat16), z3s.astype(jnp.bfloat16), dims,
        preferred_element_type=jnp.float32))

    denom = (jnp.sum(sim_intra, axis=1, keepdims=True)
             + jnp.sum(sim_inter, axis=1, keepdims=True))               # [N1, 1]
    loss = -jnp.log(pos * pl.reciprocal(denom, approx=True))
    o_ref[...] = jnp.mean(loss, axis=0, keepdims=True)                  # [1, 1]


def contrastive_loss(z1, z2, z3, tau1, tau2):
    kernel = functools.partial(_contrastive_kernel, tau1=tau1, tau2=tau2)
    out = pl.pallas_call(
        kernel,
        out_shape=jax.ShapeDtypeStruct((1, 1), jnp.float32),
        grid=(1,),
        in_specs=[_full_spec(z1.shape), _full_spec(z2.shape), _full_spec(z3.shape)],
        out_specs=_full_spec((1, 1)),
    )(z1, z2, z3)
    return out[0, 0]


# ---------------------------------------------------------------------------
# Model glue (plain JAX, fully jittable)
# ---------------------------------------------------------------------------
def normalize_adj(a):
    # A_hat = D^-1 (A + I)
    n = a.shape[0]
    a = a + jnp.eye(n, dtype=a.dtype)
    deg = jnp.sum(a, axis=1, keepdims=True)
    return a / jnp.maximum(deg, 1.0)


def glorot(key, shape):
    fan_in, fan_out = shape
    lim = (6.0 / (fan_in + fan_out)) ** 0.5
    return jax.random.uniform(key, shape, jnp.float32, -lim, lim)


def _pad2(w, rows, cols):
    out = jnp.zeros((rows, cols), jnp.float32)
    return out.at[: w.shape[0], : w.shape[1]].set(w)


def init_params(key, in_dim, num_hidden, num_layers, f_pad, h_pad):
    """Logical-size glorot weights zero-padded to lane-dense (128-multiple) dims."""
    keys = jax.random.split(key, num_layers + 2)
    enc_params = []
    d_in, d_in_p = in_dim, f_pad
    for l in range(num_layers):
        w = glorot(keys[l], (d_in, num_hidden))
        enc_params.append((_pad2(w, d_in_p, h_pad), jnp.zeros((1, h_pad), jnp.float32)))
        d_in, d_in_p = num_hidden, h_pad
    w_e2d = _pad2(glorot(keys[-2], (num_hidden, num_hidden)), h_pad, h_pad)   # bias=False
    w_dec = _pad2(glorot(keys[-1], (num_hidden, in_dim)), h_pad, f_pad)       # decoder='linear'
    b_dec = jnp.zeros((1, f_pad), jnp.float32)
    enc_mask_token = jnp.zeros((1, f_pad), jnp.float32)
    return enc_params, w_e2d, (w_dec, b_dec), enc_mask_token


def premodel_forward(params, x, A, edge_src, edge_dst, rng,
                     mask_rate_node=0.3, mask_rate_edge=0.3, replace_rate=0.1,
                     alpha_l=2, lambda_=0.01, tau1=0.5, tau2=0.5):
    enc_params, w_e2d, (w_dec, b_dec), enc_mask_token = params
    n = x.shape[0]
    e = edge_src.shape[0]
    k_node, k_mask, k_noise, k_edge = jax.random.split(rng, 4)

    # ---- node masking -----------------------------------------------------
    perm_node = jax.random.permutation(k_node, n)
    num_mask_nodes = int(mask_rate_node * n)
    n1 = n - num_mask_nodes
    mask_nodes = perm_node[:num_mask_nodes]
    keep_nodes = jnp.sort(perm_node[num_mask_nodes:])   # remove_nodes keeps original order

    # encoding_mask_noise (replace_rate > 0 branch)
    mask_token_rate = 1.0 - replace_rate
    num_noise = int(replace_rate * num_mask_nodes)
    num_token = int(mask_token_rate * num_mask_nodes)
    perm_mask = jax.random.permutation(k_mask, num_mask_nodes)
    token_nodes = mask_nodes[perm_mask[:num_token]]
    use_x = x.at[token_nodes].set(0.0)
    if num_noise > 0:
        noise_nodes = mask_nodes[perm_mask[num_mask_nodes - num_noise:]]
        noise_src = jax.random.permutation(k_noise, n)[:num_noise]
        use_x = use_x.at[noise_nodes].set(x[noise_src])
    use_x = use_x.at[token_nodes].add(enc_mask_token[0])

    # ---- edge masking (g2) -------------------------------------------------
    # TODO(synk): original code uses num_nodes as the edge count (bug); mirrored here.
    perm_edge = jax.random.permutation(k_edge, n)
    num_mask_edges = int(mask_rate_edge * n)
    mask_edges = perm_edge[:num_mask_edges]
    keep_e = jnp.ones((e,), jnp.float32).at[mask_edges].set(0.0)
    A2 = jnp.zeros((n, n), jnp.float32)
    A2 = A2.at[edge_src, edge_dst].max(keep_e)
    A2 = A2.at[edge_dst, edge_src].max(keep_e)

    # ---- graphs -------------------------------------------------------------
    A_hat = normalize_adj(A)                                  # g
    A1 = A[keep_nodes][:, keep_nodes]                         # g1 = remove_nodes(mask_nodes)
    A1p = jnp.zeros((n, n), A.dtype).at[:n1, :n1].set(A1)     # pad back to N (isolated pads)
    A1_hat = normalize_adj(A1p)
    A2_hat = normalize_adj(A2)                                # g2 = remove_edges(mask_edges)
    x_g1p = jnp.zeros_like(x).at[:n1].set(x[keep_nodes])

    # ---- batched fused encoder: slot 0 -> z3(g,use_x), 1 -> z1(g1), 2 -> z2(g2) ----
    a_stack = jnp.stack([A_hat, A1_hat, A2_hat]).astype(jnp.bfloat16)
    x_stack = jnp.stack([use_x, x_g1p, x]).astype(jnp.bfloat16)
    z_stack = batched_gcn_encoder(a_stack, x_stack, enc_params)
    z3 = z_stack[0]
    z1 = z_stack[1, :n1]          # drop padded rows of g1
    z2 = z_stack[2]

    # ---- mask_attr_prediction (GAE reconstruction) --------------------------
    recon = fused_decoder(z3, w_e2d, w_dec, b_dec)   # e2d (no bias) + linear decoder
    x_init = x[mask_nodes]
    x_rec = recon[mask_nodes]
    loss_gae = sce_loss(x_rec, x_init, alpha=alpha_l)

    # ---- contrastive loss ----------------------------------------------------
    # TODO(synk): original code references undefined self._tau1/_tau2 and
    # calculate_current_tau; fixed tau1/tau2 constants are used instead.
    loss_cl = contrastive_loss(z1, z2, z3, tau1, tau2)

    loss = loss_gae + lambda_ * loss_cl
    loss_item = {"loss": loss, "loss_GAE": loss_gae, "loss_CL": loss_cl}  # arrays, no host sync
    return loss, loss_gae, loss_cl, loss_item


# ---------------------------------------------------------------------------
if __name__ == "__main__":
    key = jax.random.PRNGKey(0)
    k_feat, k_src, k_dst, k_par, k_fwd = jax.random.split(key, 5)

    # small logical shapes; feature/hidden dims zero-padded to 128 lanes
    N, IN_DIM, NUM_HIDDEN, NUM_LAYERS, E = 64, 32, 32, 2, 128
    F_PAD, H_PAD = 128, 128

    x_raw = jax.random.normal(k_feat, (N, IN_DIM), jnp.float32)
    x = jnp.zeros((N, F_PAD), jnp.float32).at[:, :IN_DIM].set(x_raw)

    edge_src = jax.random.randint(k_src, (E,), 0, N)
    edge_dst = jax.random.randint(k_dst, (E,), 0, N)
    A = jnp.zeros((N, N), jnp.float32)
    A = A.at[edge_src, edge_dst].max(1.0)
    A = A.at[edge_dst, edge_src].max(1.0)

    params = init_params(k_par, IN_DIM, NUM_HIDDEN, NUM_LAYERS, F_PAD, H_PAD)

    fwd = jax.jit(premodel_forward)
    loss, loss_gae, loss_cl, loss_item = fwd(params, x, A, edge_src, edge_dst, k_fwd)
    jax.block_until_ready(loss)
    print("KERNEL_OK")
</pallas_src>

<mosaic_0001>
module attributes {stable_mosaic.version = 11 : i64} {
  func.func private @main(%arg0: i32) attributes {dimension_semantics = [#tpu.dimension_semantics<core_parallel>], iteration_bounds = array<i64: 2>, tpu.core_type = #tpu.core_type<sc_scalar_subcore>, window_params = []} {
    return
  }
}

module attributes {stable_mosaic.version = 11 : i64} {
  func.func private @main(%arg0: i32) attributes {dimension_semantics = [#tpu.dimension_semantics<core_parallel>], iteration_bounds = array<i64: 2>, tpu.core_type = #tpu.core_type<sc_scalar_subcore>, window_params = []} {
    return
  }
}

module attributes {stable_mosaic.version = 11 : i64} {
  func.func @_decoder_kernel(%arg0: i32, %arg1: memref<64x128xf32, #tpu.memory_space<vmem>>, %arg2: memref<128x128xbf16, #tpu.memory_space<vmem>>, %arg3: memref<128x128xbf16, #tpu.memory_space<vmem>>, %arg4: memref<1x128xf32, #tpu.memory_space<vmem>>, %arg5: memref<64x128xf32, #tpu.memory_space<vmem>>) attributes {dimension_semantics = [#tpu.dimension_semantics<arbitrary>], iteration_bounds = array<i64: 1>, scalar_prefetch = 0 : i64, scratch_operands = 0 : i64, tpu.core_type = #tpu.core_type<tc>, window_params = [{pipeline_mode = #tpu.pipeline_mode<synchronous>, transform_indices = @transform_0, window_bounds = array<i64: 64, 128>}, {pipeline_mode = #tpu.pipeline_mode<synchronous>, transform_indices = @transform_1, window_bounds = array<i64: 128, 128>}, {pipeline_mode = #tpu.pipeline_mode<synchronous>, transform_indices = @transform_2, window_bounds = array<i64: 128, 128>}, {pipeline_mode = #tpu.pipeline_mode<synchronous>, transform_indices = @transform_3, window_bounds = array<i64: 1, 128>}, {pipeline_mode = #tpu.pipeline_mode<synchronous>, transform_indices = @transform_4, window_bounds = array<i64: 64, 128>}]} {
    %c0 = arith.constant 0 : index
    %c0_0 = arith.constant 0 : index
    %0 = vector.load %arg1[%c0, %c0_0] : memref<64x128xf32, #tpu.memory_space<vmem>>, vector<64x128xf32>
    %1 = arith.truncf %0 : vector<64x128xf32> to vector<64x128xbf16>
    %c0_1 = arith.constant 0 : index
    %c0_2 = arith.constant 0 : index
    %2 = vector.load %arg2[%c0_1, %c0_2] : memref<128x128xbf16, #tpu.memory_space<vmem>>, vector<128x128xbf16>
    %cst = arith.constant dense<0.000000e+00> : vector<64x128xf32>
    %3 = tpu.matmul %1, %2, %cst {dimension_numbers = #tpu.dot_dimension_numbers<[1], [0], [0], [1], [0, 0, 1, 1], [], []>} : vector<64x128xbf16>, vector<128x128xbf16>, vector<64x128xf32> -> vector<64x128xf32>
    %4 = arith.truncf %3 : vector<64x128xf32> to vector<64x128xbf16>
    %c0_3 = arith.constant 0 : index
    %c0_4 = arith.constant 0 : index
    %5 = vector.load %arg3[%c0_3, %c0_4] : memref<128x128xbf16, #tpu.memory_space<vmem>>, vector<128x128xbf16>
    %cst_5 = arith.constant dense<0.000000e+00> : vector<64x128xf32>
    %6 = tpu.matmul %4, %5, %cst_5 {dimension_numbers = #tpu.dot_dimension_numbers<[1], [0], [0], [1], [0, 0, 1, 1], [], []>} : vector<64x128xbf16>, vector<128x128xbf16>, vector<64x128xf32> -> vector<64x128xf32>
    %c0_6 = arith.constant 0 : index
    %c0_7 = arith.constant 0 : index
    %7 = vector.load %arg4[%c0_6, %c0_7] : memref<1x128xf32, #tpu.memory_space<vmem>>, vector<1x128xf32>
    %8 = vector.broadcast %7 : vector<1x128xf32> to vector<64x128xf32>
    %9 = arith.addf %6, %8 : vector<64x128xf32>
    %c0_8 = arith.constant 0 : index
    %c0_9 = arith.constant 0 : index
    %10 = vector.load %arg5[%c0_8, %c0_9] : memref<64x128xf32, #tpu.memory_space<vmem>>, vector<64x128xf32>
    tpu.vector_store %arg5[%c0_8, %c0_9], %9 {strides = array<i32>} : memref<64x128xf32, #tpu.memory_space<vmem>>, vector<64x128xf32>,
    return
  }
  func.func @transform_0(%arg0: i32) -> (i32, i32) {
    %c0_i32 = arith.constant 0 : i32
    %c0_i32_0 = arith.constant 0 : i32
    %c0_i32_1 = arith.constant 0 : i32
    return %c0_i32, %c0_i32_0 : i32, i32
  }
  func.func @transform_1(%arg0: i32) -> (i32, i32) {
    %c0_i32 = arith.constant 0 : i32
    %c0_i32_0 = arith.constant 0 : i32
    %c0_i32_1 = arith.constant 0 : i32
    return %c0_i32, %c0_i32_0 : i32, i32
  }
  func.func @transform_2(%arg0: i32) -> (i32, i32) {
    %c0_i32 = arith.constant 0 : i32
    %c0_i32_0 = arith.constant 0 : i32
    %c0_i32_1 = arith.constant 0 : i32
    return %c0_i32, %c0_i32_0 : i32, i32
  }
  func.func @transform_3(%arg0: i32) -> (i32, i32) {
    %c0_i32 = arith.constant 0 : i32
    %c0_i32_0 = arith.constant 0 : i32
    %c0_i32_1 = arith.constant 0 : i32
    return %c0_i32, %c0_i32_0 : i32, i32
  }
  func.func @transform_4(%arg0: i32) -> (i32, i32) {
    %c0_i32 = arith.constant 0 : i32
    %c0_i32_0 = arith.constant 0 : i32
    %c0_i32_1 = arith.constant 0 : i32
    return %c0_i32, %c0_i32_0 : i32, i32
  }
}

module attributes {stable_mosaic.version = 11 : i64} {
  func.func @_batched_gcn_encoder_kernel(%arg0: i32, %arg1: memref<1x64x64xbf16, #tpu.memory_space<vmem>>, %arg2: memref<1x64x128xbf16, #tpu.memory_space<vmem>>, %arg3: memref<128x128xbf16, #tpu.memory_space<vmem>>, %arg4: memref<1x128xf32, #tpu.memory_space<vmem>>, %arg5: memref<128x128xbf16, #tpu.memory_space<vmem>>, %arg6: memref<1x128xf32, #tpu.memory_space<vmem>>, %arg7: memref<1x64x128xf32, #tpu.memory_space<vmem>>) attributes {dimension_semantics = [#tpu.dimension_semantics<parallel>], iteration_bounds = array<i64: 3>, scalar_prefetch = 0 : i64, scratch_operands = 0 : i64, tpu.core_type = #tpu.core_type<tc>, window_params = [{transform_indices = @transform_0, window_bounds = array<i64: 1, 64, 64>}, {transform_indices = @transform_1, window_bounds = array<i64: 1, 64, 128>}, {pipeline_mode = #tpu.pipeline_mode<synchronous>, transform_indices = @transform_2, window_bounds = array<i64: 128, 128>}, {pipeline_mode = #tpu.pipeline_mode<synchronous>, transform_indices = @transform_3, window_bounds = array<i64: 1, 128>}, {pipeline_mode = #tpu.pipeline_mode<synchronous>, transform_indices = @transform_4, window_bounds = array<i64: 128, 128>}, {pipeline_mode = #tpu.pipeline_mode<synchronous>, transform_indices = @transform_5, window_bounds = array<i64: 1, 128>}, {transform_indices = @transform_6, window_bounds = array<i64: 1, 64, 128>}]} {
    %c0 = arith.constant 0 : index
    %c0_0 = arith.constant 0 : index
    %c0_1 = arith.constant 0 : index
    %0 = vector.load %arg1[%c0, %c0_0, %c0_1] : memref<1x64x64xbf16, #tpu.memory_space<vmem>>, vector<1x64x64xbf16>
    %1 = vector.shape_cast %0 : vector<1x64x64xbf16> to vector<64x64xbf16>
    %c0_2 = arith.constant 0 : index
    %c0_3 = arith.constant 0 : index
    %c0_4 = arith.constant 0 : index
    %2 = vector.load %arg2[%c0_2, %c0_3, %c0_4] : memref<1x64x128xbf16, #tpu.memory_space<vmem>>, vector<1x64x128xbf16>
    %3 = vector.shape_cast %2 : vector<1x64x128xbf16> to vector<64x128xbf16>
    %c0_5 = arith.constant 0 : index
    %c0_6 = arith.constant 0 : index
    %4 = vector.load %arg3[%c0_5, %c0_6] : memref<128x128xbf16, #tpu.memory_space<vmem>>, vector<128x128xbf16>
    %c0_7 = arith.constant 0 : index
    %c0_8 = arith.constant 0 : index
    %5 = vector.load %arg4[%c0_7, %c0_8] : memref<1x128xf32, #tpu.memory_space<vmem>>, vector<1x128xf32>
    %cst = arith.constant dense<0.000000e+00> : vector<64x128xf32>
    %6 = tpu.matmul %3, %4, %cst {dimension_numbers = #tpu.dot_dimension_numbers<[1], [0], [0], [1], [0, 0, 1, 1], [], []>} : vector<64x128xbf16>, vector<128x128xbf16>, vector<64x128xf32> -> vector<64x128xf32>
    %7 = arith.truncf %6 : vector<64x128xf32> to vector<64x128xbf16>
    %cst_9 = arith.constant dense<0.000000e+00> : vector<64x128xf32>
    %8 = tpu.matmul %1, %7, %cst_9 {dimension_numbers = #tpu.dot_dimension_numbers<[1], [0], [0], [1], [0, 0, 1, 1], [], []>} : vector<64x64xbf16>, vector<64x128xbf16>, vector<64x128xf32> -> vector<64x128xf32>
    %9 = vector.broadcast %5 : vector<1x128xf32> to vector<64x128xf32>
    %10 = arith.addf %8, %9 : vector<64x128xf32>
    %cst_10 = arith.constant 0.000000e+00 : f32
    %11 = vector.broadcast %cst_10 : f32 to vector<64x128xf32>
    %12 = arith.maximumf %10, %11 : vector<64x128xf32>
    %13 = arith.truncf %12 : vector<64x128xf32> to vector<64x128xbf16>
    %c0_11 = arith.constant 0 : index
    %c0_12 = arith.constant 0 : index
    %14 = vector.load %arg5[%c0_11, %c0_12] : memref<128x128xbf16, #tpu.memory_space<vmem>>, vector<128x128xbf16>
    %c0_13 = arith.constant 0 : index
    %c0_14 = arith.constant 0 : index
    %15 = vector.load %arg6[%c0_13, %c0_14] : memref<1x128xf32, #tpu.memory_space<vmem>>, vector<1x128xf32>
    %cst_15 = arith.constant dense<0.000000e+00> : vector<64x128xf32>
    %16 = tpu.matmul %13, %14, %cst_15 {dimension_numbers = #tpu.dot_dimension_numbers<[1], [0], [0], [1], [0, 0, 1, 1], [], []>} : vector<64x128xbf16>, vector<128x128xbf16>, vector<64x128xf32> -> vector<64x128xf32>
    %17 = arith.truncf %16 : vector<64x128xf32> to vector<64x128xbf16>
    %cst_16 = arith.constant dense<0.000000e+00> : vector<64x128xf32>
    %18 = tpu.matmul %1, %17, %cst_16 {dimension_numbers = #tpu.dot_dimension_numbers<[1], [0], [0], [1], [0, 0, 1, 1], [], []>} : vector<64x64xbf16>, vector<64x128xbf16>, vector<64x128xf32> -> vector<64x128xf32>
    %19 = vector.broadcast %15 : vector<1x128xf32> to vector<64x128xf32>
    %20 = arith.addf %18, %19 : vector<64x128xf32>
    %cst_17 = arith.constant 0.000000e+00 : f32
    %21 = vector.broadcast %cst_17 : f32 to vector<64x128xf32>
    %22 = arith.maximumf %20, %21 : vector<64x128xf32>
    %c0_18 = arith.constant 0 : index
    %c0_19 = arith.constant 0 : index
    %c0_20 = arith.constant 0 : index
    %23 = vector.load %arg7[%c0_18, %c0_19, %c0_20] : memref<1x64x128xf32, #tpu.memory_space<vmem>>, vector<1x64x128xf32>
    %24 = vector.shape_cast %23 : vector<1x64x128xf32> to vector<64x128xf32>
    %25 = vector.shape_cast %22 : vector<64x128xf32> to vector<1x64x128xf32>
    tpu.vector_store %arg7[%c0_18, %c0_19, %c0_20], %25 {strides = array<i32>} : memref<1x64x128xf32, #tpu.memory_space<vmem>>, vector<1x64x128xf32>,
    return
  }
  func.func @transform_0(%arg0: i32) -> (i32, i32, i32) {
    %c0_i32 = arith.constant 0 : i32
    %c0_i32_0 = arith.constant 0 : i32
    %c0_i32_1 = arith.constant 0 : i32
    return %arg0, %c0_i32, %c0_i32_0 : i32, i32, i32
  }
  func.func @transform_1(%arg0: i32) -> (i32, i32, i32) {
    %c0_i32 = arith.constant 0 : i32
    %c0_i32_0 = arith.constant 0 : i32
    %c0_i32_1 = arith.constant 0 : i32
    return %arg0, %c0_i32, %c0_i32_0 : i32, i32, i32
  }
  func.func @transform_2(%arg0: i32) -> (i32, i32) {
    %c0_i32 = arith.constant 0 : i32
    %c0_i32_0 = arith.constant 0 : i32
    %c0_i32_1 = arith.constant 0 : i32
    return %c0_i32, %c0_i32_0 : i32, i32
  }
  func.func @transform_3(%arg0: i32) -> (i32, i32) {
    %c0_i32 = arith.constant 0 : i32
    %c0_i32_0 = arith.constant 0 : i32
    %c0_i32_1 = arith.constant 0 : i32
    return %c0_i32, %c0_i32_0 : i32, i32
  }
  func.func @transform_4(%arg0: i32) -> (i32, i32) {
    %c0_i32 = arith.constant 0 : i32
    %c0_i32_0 = arith.constant 0 : i32
    %c0_i32_1 = arith.constant 0 : i32
    return %c0_i32, %c0_i32_0 : i32, i32
  }
  func.func @transform_5(%arg0: i32) -> (i32, i32) {
    %c0_i32 = arith.constant 0 : i32
    %c0_i32_0 = arith.constant 0 : i32
    %c0_i32_1 = arith.constant 0 : i32
    return %c0_i32, %c0_i32_0 : i32, i32
  }
  func.func @transform_6(%arg0: i32) -> (i32, i32, i32) {
    %c0_i32 = arith.constant 0 : i32
    %c0_i32_0 = arith.constant 0 : i32
    %c0_i32_1 = arith.constant 0 : i32
    return %arg0, %c0_i32, %c0_i32_0 : i32, i32, i32
  }
}

module attributes {stable_mosaic.version = 11 : i64} {
  func.func @_contrastive_kernel(%arg0: i32, %arg1: memref<45x128xf32, #tpu.memory_space<vmem>>, %arg2: memref<64x128xf32, #tpu.memory_space<vmem>>, %arg3: memref<64x128xf32, #tpu.memory_space<vmem>>, %arg4: memref<1x1xf32, #tpu.memory_space<vmem>>) attributes {dimension_semantics = [#tpu.dimension_semantics<arbitrary>], iteration_bounds = array<i64: 1>, scalar_prefetch = 0 : i64, scratch_operands = 0 : i64, tpu.core_type = #tpu.core_type<tc>, window_params = [{pipeline_mode = #tpu.pipeline_mode<synchronous>, transform_indices = @transform_0, window_bounds = array<i64: 45, 128>}, {pipeline_mode = #tpu.pipeline_mode<synchronous>, transform_indices = @transform_1, window_bounds = array<i64: 64, 128>}, {pipeline_mode = #tpu.pipeline_mode<synchronous>, transform_indices = @transform_2, window_bounds = array<i64: 64, 128>}, {pipeline_mode = #tpu.pipeline_mode<synchronous>, transform_indices = @transform_3, window_bounds = array<i64: 1, 1>}]} {
    %c0 = arith.constant 0 : index
    %c0_0 = arith.constant 0 : index
    %0 = vector.load %arg1[%c0, %c0_0] : memref<45x128xf32, #tpu.memory_space<vmem>>, vector<45x128xf32>
    %c0_1 = arith.constant 0 : index
    %c0_2 = arith.constant 0 : index
    %1 = vector.load %arg2[%c0_1, %c0_2] : memref<64x128xf32, #tpu.memory_space<vmem>>, vector<64x128xf32>
    %c0_3 = arith.constant 0 : index
    %c0_4 = arith.constant 0 : index
    %2 = vector.load %arg3[%c0_3, %c0_4] : memref<64x128xf32, #tpu.memory_space<vmem>>, vector<64x128xf32>
    %3 = arith.mulf %0, %0 : vector<45x128xf32>
    %cst = arith.constant dense<0.000000e+00> : vector<45xf32>
    %4 = vector.multi_reduction <add>, %3, %cst [1] : vector<45x128xf32> to vector<45xf32>
    %5 = vector.shape_cast %4 : vector<45xf32> to vector<45x1xf32>
    %cst_5 = arith.constant 9.99999996E-13 : f32
    %6 = vector.broadcast %cst_5 : f32 to vector<45x1xf32>
    %7 = arith.addf %5, %6 : vector<45x1xf32>
    %8 = math.rsqrt %7 : vector<45x1xf32>
    %9 = vector.broadcast %8 : vector<45x1xf32> to vector<45x128xf32>
    %10 = arith.mulf %0, %9 : vector<45x128xf32>
    %11 = arith.mulf %1, %1 : vector<64x128xf32>
    %cst_6 = arith.constant dense<0.000000e+00> : vector<64xf32>
    %12 = vector.multi_reduction <add>, %11, %cst_6 [1] : vector<64x128xf32> to vector<64xf32>
    %13 = vector.shape_cast %12 : vector<64xf32> to vector<64x1xf32>
    %cst_7 = arith.constant 9.99999996E-13 : f32
    %14 = vector.broadcast %cst_7 : f32 to vector<64x1xf32>
    %15 = arith.addf %13, %14 : vector<64x1xf32>
    %16 = math.rsqrt %15 : vector<64x1xf32>
    %17 = vector.broadcast %16 : vector<64x1xf32> to vector<64x128xf32>
    %18 = arith.mulf %1, %17 : vector<64x128xf32>
    %19 = arith.mulf %2, %2 : vector<64x128xf32>
    %cst_8 = arith.constant dense<0.000000e+00> : vector<64xf32>
    %20 = vector.multi_reduction <add>, %19, %cst_8 [1] : vector<64x128xf32> to vector<64xf32>
    %21 = vector.shape_cast %20 : vector<64xf32> to vector<64x1xf32>
    %cst_9 = arith.constant 9.99999996E-13 : f32
    %22 = vector.broadcast %cst_9 : f32 to vector<64x1xf32>
    %23 = arith.addf %21, %22 : vector<64x1xf32>
    %24 = math.rsqrt %23 : vector<64x1xf32>
    %25 = vector.broadcast %24 : vector<64x1xf32> to vector<64x128xf32>
    %26 = arith.mulf %2, %25 : vector<64x128xf32>
    %cst_10 = arith.constant 2.000000e+00 : f32
    %27 = vector.broadcast %cst_10 : f32 to vector<64x128xf32>
    %28 = arith.mulf %18, %27 : vector<64x128xf32>
    %cst_11 = arith.constant 2.000000e+00 : f32
    %29 = vector.broadcast %cst_11 : f32 to vector<64x128xf32>
    %30 = arith.mulf %26, %29 : vector<64x128xf32>
    %31 = vector.extract_strided_slice %28 {offsets = [0, 0], sizes = [45, 128], strides = [1, 1]} : vector<64x128xf32> to vector<45x128xf32>
    %32 = arith.mulf %10, %31 : vector<45x128xf32>
    %cst_12 = arith.constant dense<0.000000e+00> : vector<45xf32>
    %33 = vector.multi_reduction <add>, %32, %cst_12 [1] : vector<45x128xf32> to vector<45xf32>
    %34 = vector.shape_cast %33 : vector<45xf32> to vector<45x1xf32>
    %35 = math.exp %34 : vector<45x1xf32>
    %36 = arith.truncf %10 : vector<45x128xf32> to vector<45x128xbf16>
    %37 = arith.truncf %28 : vector<64x128xf32> to vector<64x128xbf16>
    %cst_13 = arith.constant dense<0.000000e+00> : vector<45x64xf32>
    %38 = tpu.matmul %36, %37, %cst_13 {dimension_numbers = #tpu.dot_dimension_numbers<[1], [1], [0], [0], [0, 0, 1, 0], [], []>} : vector<45x128xbf16>, vector<64x128xbf16>, vector<45x64xf32> -> vector<45x64xf32>
    %39 = math.exp %38 : vector<45x64xf32>
    %40 = arith.truncf %10 : vector<45x128xf32> to vector<45x128xbf16>
    %41 = arith.truncf %30 : vector<64x128xf32> to vector<64x128xbf16>
    %cst_14 = arith.constant dense<0.000000e+00> : vector<45x64xf32>
    %42 = tpu.matmul %40, %41, %cst_14 {dimension_numbers = #tpu.dot_dimension_numbers<[1], [1], [0], [0], [0, 0, 1, 0], [], []>} : vector<45x128xbf16>, vector<64x128xbf16>, vector<45x64xf32> -> vector<45x64xf32>
    %43 = math.exp %42 : vector<45x64xf32>
    %cst_15 = arith.constant dense<0.000000e+00> : vector<45xf32>
    %44 = vector.multi_reduction <add>, %39, %cst_15 [1] : vector<45x64xf32> to vector<45xf32>
    %45 = vector.shape_cast %44 : vector<45xf32> to vector<45x1xf32>
    %cst_16 = arith.constant dense<0.000000e+00> : vector<45xf32>
    %46 = vector.multi_reduction <add>, %43, %cst_16 [1] : vector<45x64xf32> to vector<45xf32>
    %47 = vector.shape_cast %46 : vector<45xf32> to vector<45x1xf32>
    %48 = arith.addf %45, %47 : vector<45x1xf32>
    %49 = tpu.reciprocal %48 {approx = true} : vector<45x1xf32> -> vector<45x1xf32>
    %50 = arith.mulf %35, %49 : vector<45x1xf32>
    %51 = math.log %50 : vector<45x1xf32>
    %cst_17 = arith.constant 0.000000e+00 : f32
    %52 = vector.broadcast %cst_17 : f32 to vector<45x1xf32>
    %53 = arith.subf %52, %51 : vector<45x1xf32>
    %cst_18 = arith.constant dense<0.000000e+00> : vector<1xf32>
    %54 = vector.multi_reduction <add>, %53, %cst_18 [0] : vector<45x1xf32> to vector<1xf32>
    %55 = vector.shape_cast %54 : vector<1xf32> to vector<1x1xf32>
    %cst_19 = arith.constant 4.500000e+01 : f32
    %56 = vector.broadcast %cst_19 : f32 to vector<1x1xf32>
    %57 = arith.divf %55, %56 : vector<1x1xf32>
    %c0_20 = arith.constant 0 : index
    %c0_21 = arith.constant 0 : index
    %58 = vector.load %arg4[%c0_20, %c0_21] : memref<1x1xf32, #tpu.memory_space<vmem>>, vector<1x1xf32>
    tpu.vector_store %arg4[%c0_20, %c0_21], %57 {strides = array<i32>} : memref<1x1xf32, #tpu.memory_space<vmem>>, vector<1x1xf32>,
    return
  }
  func.func @transform_0(%arg0: i32) -> (i32, i32) {
    %c0_i32 = arith.constant 0 : i32
    %c0_i32_0 = arith.constant 0 : i32
    %c0_i32_1 = arith.constant 0 : i32
    return %c0_i32, %c0_i32_0 : i32, i32
  }
  func.func @transform_1(%arg0: i32) -> (i32, i32) {
    %c0_i32 = arith.constant 0 : i32
    %c0_i32_0 = arith.constant 0 : i32
    %c0_i32_1 = arith.constant 0 : i32
    return %c0_i32, %c0_i32_0 : i32, i32
  }
  func.func @transform_2(%arg0: i32) -> (i32, i32) {
    %c0_i32 = arith.constant 0 : i32
    %c0_i32_0 = arith.constant 0 : i32
    %c0_i32_1 = arith.constant 0 : i32
    return %c0_i32, %c0_i32_0 : i32, i32
  }
  func.func @transform_3(%arg0: i32) -> (i32, i32) {
    %c0_i32 = arith.constant 0 : i32
    %c0_i32_0 = arith.constant 0 : i32
    %c0_i32_1 = arith.constant 0 : i32
    return %c0_i32, %c0_i32_0 : i32, i32
  }
}

module attributes {stable_mosaic.version = 11 : i64} {
  func.func @_sce_loss_kernel(%arg0: i32, %arg1: memref<19x128xf32, #tpu.memory_space<vmem>>, %arg2: memref<19x128xf32, #tpu.memory_space<vmem>>, %arg3: memref<1x1xf32, #tpu.memory_space<vmem>>) attributes {dimension_semantics = [#tpu.dimension_semantics<arbitrary>], iteration_bounds = array<i64: 1>, scalar_prefetch = 0 : i64, scratch_operands = 0 : i64, tpu.core_type = #tpu.core_type<tc>, window_params = [{pipeline_mode = #tpu.pipeline_mode<synchronous>, transform_indices = @transform_0, window_bounds = array<i64: 19, 128>}, {pipeline_mode = #tpu.pipeline_mode<synchronous>, transform_indices = @transform_1, window_bounds = array<i64: 19, 128>}, {pipeline_mode = #tpu.pipeline_mode<synchronous>, transform_indices = @transform_2, window_bounds = array<i64: 1, 1>}]} {
    %c0 = arith.constant 0 : index
    %c0_0 = arith.constant 0 : index
    %0 = vector.load %arg1[%c0, %c0_0] : memref<19x128xf32, #tpu.memory_space<vmem>>, vector<19x128xf32>
    %c0_1 = arith.constant 0 : index
    %c0_2 = arith.constant 0 : index
    %1 = vector.load %arg2[%c0_1, %c0_2] : memref<19x128xf32, #tpu.memory_space<vmem>>, vector<19x128xf32>
    %2 = arith.mulf %0, %0 : vector<19x128xf32>
    %cst = arith.constant dense<0.000000e+00> : vector<19xf32>
    %3 = vector.multi_reduction <add>, %2, %cst [1] : vector<19x128xf32> to vector<19xf32>
    %4 = vector.shape_cast %3 : vector<19xf32> to vector<19x1xf32>
    %cst_3 = arith.constant 9.99999996E-13 : f32
    %5 = vector.broadcast %cst_3 : f32 to vector<19x1xf32>
    %6 = arith.addf %4, %5 : vector<19x1xf32>
    %7 = math.rsqrt %6 : vector<19x1xf32>
    %8 = vector.broadcast %7 : vector<19x1xf32> to vector<19x128xf32>
    %9 = arith.mulf %0, %8 : vector<19x128xf32>
    %10 = arith.mulf %1, %1 : vector<19x128xf32>
    %cst_4 = arith.constant dense<0.000000e+00> : vector<19xf32>
    %11 = vector.multi_reduction <add>, %10, %cst_4 [1] : vector<19x128xf32> to vector<19xf32>
    %12 = vector.shape_cast %11 : vector<19xf32> to vector<19x1xf32>
    %cst_5 = arith.constant 9.99999996E-13 : f32
    %13 = vector.broadcast %cst_5 : f32 to vector<19x1xf32>
    %14 = arith.addf %12, %13 : vector<19x1xf32>
    %15 = math.rsqrt %14 : vector<19x1xf32>
    %16 = vector.broadcast %15 : vector<19x1xf32> to vector<19x128xf32>
    %17 = arith.mulf %1, %16 : vector<19x128xf32>
    %18 = arith.mulf %9, %17 : vector<19x128xf32>
    %cst_6 = arith.constant dense<0.000000e+00> : vector<19xf32>
    %19 = vector.multi_reduction <add>, %18, %cst_6 [1] : vector<19x128xf32> to vector<19xf32>
    %20 = vector.shape_cast %19 : vector<19xf32> to vector<19x1xf32>
    %cst_7 = arith.constant 1.000000e+00 : f32
    %21 = vector.broadcast %cst_7 : f32 to vector<19x1xf32>
    %22 = arith.subf %21, %20 : vector<19x1xf32>
    %23 = arith.mulf %22, %22 : vector<19x1xf32>
    %cst_8 = arith.constant dense<0.000000e+00> : vector<1xf32>
    %24 = vector.multi_reduction <add>, %23, %cst_8 [0] : vector<19x1xf32> to vector<1xf32>
    %25 = vector.shape_cast %24 : vector<1xf32> to vector<1x1xf32>
    %cst_9 = arith.constant 1.900000e+01 : f32
    %26 = vector.broadcast %cst_9 : f32 to vector<1x1xf32>
    %27 = arith.divf %25, %26 : vector<1x1xf32>
    %c0_10 = arith.constant 0 : index
    %c0_11 = arith.constant 0 : index
    %28 = vector.load %arg3[%c0_10, %c0_11] : memref<1x1xf32, #tpu.memory_space<vmem>>, vector<1x1xf32>
    tpu.vector_store %arg3[%c0_10, %c0_11], %27 {strides = array<i32>} : memref<1x1xf32, #tpu.memory_space<vmem>>, vector<1x1xf32>,
    return
  }
  func.func @transform_0(%arg0: i32) -> (i32, i32) {
    %c0_i32 = arith.constant 0 : i32
    %c0_i32_0 = arith.constant 0 : i32
    %c0_i32_1 = arith.constant 0 : i32
    return %c0_i32, %c0_i32_0 : i32, i32
  }
  func.func @transform_1(%arg0: i32) -> (i32, i32) {
    %c0_i32 = arith.constant 0 : i32
    %c0_i32_0 = arith.constant 0 : i32
    %c0_i32_1 = arith.constant 0 : i32
    return %c0_i32, %c0_i32_0 : i32, i32
  }
  func.func @transform_2(%arg0: i32) -> (i32, i32) {
    %c0_i32 = arith.constant 0 : i32
    %c0_i32_0 = arith.constant 0 : i32
    %c0_i32_1 = arith.constant 0 : i32
    return %c0_i32, %c0_i32_0 : i32, i32
  }
}

</mosaic_0001>

<bundles_post_ra>
// kernel: premodel_forward.7
= control target key start
LH: loop header
LB: loop body
LE: loop exit
PB: predicated region body
PF: predicated region fallthrough
CT: control target
= control target key end

     0   :  { %s540_s1 = inlined_call_operand.vmem [shape: bf16[128,128], index: 1, kind: input, shape index: {}]   ;;  %s541_s0 = inlined_call_operand.vmem [shape: f32[64,128], index: 0, kind: input, shape index: {}]   ;;  %s542_s2 = inlined_call_operand.vmem [shape: bf16[128,128], index: 2, kind: input, shape index: {}]   ;;  %s543_s3 = inlined_call_operand.vmem [shape: f32[1,128], index: 3, kind: input, shape index: {}]   ;;  %s544_s4 = inlined_call_operand.vmem [shape: f32[64,128], index: 4, kind: output, shape index: {}]  }
   0x1   :  { %v400_v0 = vld [vmem:[%s540_s1] sm:$0xff]   ;;  %v401_v1 = vld [vmem:[%s540_s1 + $0x8] sm:$0xff]   ;;  %v402_v2 = vld [vmem:[%s540_s1 + $0x10] sm:$0xff]  }
   0x2   :  { %352 = vmatprep.subr.bf16.mxu0 %v400_v0  ;;  %v403_v3 = vld [vmem:[%s540_s1 + $0x18] sm:$0xff]   ;;  %v18_v4 = vld [vmem:[%s541_s0] sm:$0xff]  ;;  %v19_v5 = vld [vmem:[%s541_s0 + $0x8] sm:$0xff] }
   0x3   :  { %353 = vmatpush3.bf16.msra.mxu0 %v400_v0  ;;  %v26_v6 = vpack.c.bf16 %v19_v5, %v18_v4  ;;  %v404_v7 = vld [vmem:[%s540_s1 + $0x20] sm:$0xff]   ;;  %v409_v9 = vld [vmem:[%s542_s2 + $0x8] sm:$0xff]   ;;  %v410_v10 = vld [vmem:[%s542_s2 + $0x10] sm:$0xff]  }
   0x4   :  { %354 = vmatprep.subr.bf16.mxu0 %v401_v1  ;;  %v408_v8 = vld [vmem:[%s542_s2] sm:$0xff]   ;;  %v405_v11 = vld [vmem:[%s540_s1 + $0x28] sm:$0xff]   ;;  %v411_v12 = vld [vmem:[%s542_s2 + $0x18] sm:$0xff]  }
   0x5   :  { %368 = vmatprep.mubr.bf16.mxu0 %v26_v6  ;;  %376 = vmatprep.subr.bf16.mxu1 %v408_v8  ;;  %v406_v13 = vld [vmem:[%s540_s1 + $0x30] sm:$0xff]   ;;  %v412_v14 = vld [vmem:[%s542_s2 + $0x20] sm:$0xff]   ;;  %v407_v15 = vld [vmem:[%s540_s1 + $0x38] sm:$0xff]  }
   0x6   :  { %377 = vmatpush3.bf16.msra.mxu1 %v408_v8  ;;  %v20_v16 = vld [vmem:[%s541_s0 + $0x10] sm:$0xff]  ;;  %v21_v17 = vld [vmem:[%s541_s0 + $0x18] sm:$0xff]  ;;  %v413_v18 = vld [vmem:[%s542_s2 + $0x28] sm:$0xff]  }
   0x7   :  { %355 = vmatpush3.bf16.msra.mxu0 %v401_v1  ;;  %378 = vmatprep.subr.bf16.mxu1 %v409_v9  ;;  %v22_v19 = vld [vmem:[%s541_s0 + $0x20] sm:$0xff]  ;;  %v23_v20 = vld [vmem:[%s541_s0 + $0x28] sm:$0xff]  ;;  %v27_v21 = vpack.c.bf16 %v21_v17, %v20_v16  ;;  %v414_v23 = vld [vmem:[%s542_s2 + $0x30] sm:$0xff]  }
   0x8   :  { %356 = vmatprep.subr.bf16.mxu0 %v402_v2  ;;  %v28_v22 = vpack.c.bf16 %v23_v20, %v22_v19  ;;  %v24_v24 = vld [vmem:[%s541_s0 + $0x30] sm:$0xff]  ;;  %v25_v25 = vld [vmem:[%s541_s0 + $0x38] sm:$0xff]  ;;  %v319_v40 = vld [vmem:[%s543_s3] ss:$0 sm:$0xff] }
   0x9   :  { %v29_v26 = vpack.c.bf16 %v25_v25, %v24_v24  ;;  %v415_v27 = vld [vmem:[%s542_s2 + $0x38] sm:$0xff]  }
   0xa   :  { %379 = vmatpush3.bf16.msra.mxu1 %v409_v9 }
   0xb   :  { %357 = vmatpush3.bf16.msra.mxu0 %v402_v2  ;;  %380 = vmatprep.subr.bf16.mxu1 %v410_v10 }
   0xc   :  { %358 = vmatprep.subr.bf16.mxu0 %v403_v3 }
   0xe   :  { %381 = vmatpush3.bf16.msra.mxu1 %v410_v10 }
   0xf   :  { %359 = vmatpush3.bf16.msra.mxu0 %v403_v3  ;;  %382 = vmatprep.subr.bf16.mxu1 %v411_v12 }
  0x10   :  { %360 = vmatprep.subr.bf16.mxu0 %v404_v7 }
  0x12   :  { %383 = vmatpush3.bf16.msra.mxu1 %v411_v12 }
  0x13   :  { %361 = vmatpush3.bf16.msra.mxu0 %v404_v7  ;;  %384 = vmatprep.subr.bf16.mxu1 %v412_v14 }
  0x14   :  { %362 = vmatprep.subr.bf16.mxu0 %v405_v11 }
  0x16   :  { %385 = vmatpush3.bf16.msra.mxu1 %v412_v14 }
  0x17   :  { %363 = vmatpush3.bf16.msra.mxu0 %v405_v11  ;;  %386 = vmatprep.subr.bf16.mxu1 %v413_v18 }
  0x18   :  { %364 = vmatprep.subr.bf16.mxu0 %v406_v13 }
  0x1a   :  { %387 = vmatpush3.bf16.msra.mxu1 %v413_v18 }
  0x1b   :  { %365 = vmatpush3.bf16.msra.mxu0 %v406_v13  ;;  %388 = vmatprep.subr.bf16.mxu1 %v414_v23 }
  0x1c   :  { %366 = vmatprep.subr.bf16.mxu0 %v407_v15 }
  0x1e   :  { %389 = vmatpush3.bf16.msra.mxu1 %v414_v23 }
  0x1f   :  { %367 = vmatpush3.bf16.msra.mxu0 %v407_v15  ;;  %390 = vmatprep.subr.bf16.mxu1 %v415_v27 }
  0x22   :  { %369 = vmatmul.mubr.bf16.vlgmr.msra.gmra.mrb[0].mxu0 %v27_v21  ;;  %391 = vmatpush3.bf16.msra.mxu1 %v415_v27 }
  0x23   :  { %372 = vmatprep.mubr.bf16.mxu0 %v28_v22 }
  0x2a   :  { %373 = vmatmul.mubr.bf16.gmra.mrb[4].mxu0 %v29_v26 }
  0xf5   :  { %v370_v28 = vpop.f32.mrb[0].mxu0 }
  0xf6   :  { %v128_v29 = vpop.f32.mrb[1].mxu0 }
  0xf7   :  { %v371_v30 = vpop.f32.mrb[2].mxu0 }
  0xf8   :  { %v160_v31 = vpack.c.bf16 %v371_v30, %v370_v28  ;;  %v131_v32 = vpop.f32.mrb[3].mxu0 }
  0xf9   :  { %v159_v33 = vpack.c.bf16 %v131_v32, %v128_v29 }
  0xfb   :  { %392 = vmatprep.mubr.bf16.mxu1 %v159_v33 }
  0xfc   :  { %393 = vmatmul.mubr.bf16.vlgmr.msra.gmra.mrb[0].mxu1 %v160_v31 }
  0xfd   :  { %v374_v34 = vpop.f32.mrb[4].mxu0 }
  0xfe   :  { %v144_v35 = vpop.f32.mrb[5].mxu0 }
  0xff   :  { %v375_v36 = vpop.f32.mrb[6].mxu0 }
 0x100   :  { %v162_v37 = vpack.c.bf16 %v375_v36, %v374_v34  ;;  %v147_v38 = vpop.f32.mrb[7].mxu0 }
 0x101   :  { %v161_v39 = vpack.c.bf16 %v147_v38, %v144_v35 }
 0x103   :  { %396 = vmatprep.mubr.bf16.mxu1 %v161_v39 }
 0x104   :  { %397 = vmatmul.mubr.bf16.gmra.mrb[4].mxu1 %v162_v37 }
 0x1cf   :  { %v394_v41 = vpop.f32.mrb[0].mxu1 }
 0x1d0   :  { %v277_v42 = vadd.f32 %v394_v41, %v319_v40  ;;  %v268_v43 = vpop.f32.mrb[1].mxu1 }
 0x1d1   :  { %v269_v44 = vadd.f32 %v319_v40, %v268_v43  ;;  %v395_v45 = vpop.f32.mrb[2].mxu1 }
 0x1d2   :  { %301 = vst [vmem:[%s544_s4 + $0x10] sm:$0xff] %v277_v42  ;;  %v280_v46 = vadd.f32 %v395_v45, %v319_v40  ;;  %v271_v47 = vpop.f32.mrb[3].mxu1 }
 0x1d3   :  { %299 = vst [vmem:[%s544_s4] sm:$0xff] %v269_v44  ;;  %v272_v48 = vadd.f32 %v319_v40, %v271_v47 }
 0x1d4   :  { %302 = vst [vmem:[%s544_s4 + $0x18] sm:$0xff] %v280_v46 }
 0x1d5   :  { %300 = vst [vmem:[%s544_s4 + $0x8] sm:$0xff] %v272_v48 }
 0x1d7   :  { %v398_v49 = vpop.f32.mrb[4].mxu1 }
 0x1d8   :  { %v293_v50 = vadd.f32 %v398_v49, %v319_v40  ;;  %v284_v51 = vpop.f32.mrb[5].mxu1 }
 0x1d9   :  { %v285_v52 = vadd.f32 %v319_v40, %v284_v51  ;;  %v399_v53 = vpop.f32.mrb[6].mxu1 }
 0x1da   :  { %305 = vst [vmem:[%s544_s4 + $0x30] sm:$0xff] %v293_v50  ;;  %v296_v54 = vadd.f32 %v399_v53, %v319_v40  ;;  %v287_v55 = vpop.f32.mrb[7].mxu1 }
 0x1db   :  { %303 = vst [vmem:[%s544_s4 + $0x20] sm:$0xff] %v285_v52  ;;  %v288_v56 = vadd.f32 %v319_v40, %v287_v55 }
 0x1dc   :  { %306 = vst [vmem:[%s544_s4 + $0x38] sm:$0xff] %v296_v54 }
 0x1dd   :  { %304 = vst [vmem:[%s544_s4 + $0x28] sm:$0xff] %v288_v56 }

// kernel: premodel_forward.9
= control target key start
LH: loop header
LB: loop body
LE: loop exit
PB: predicated region body
PF: predicated region fallthrough
CT: control target
= control target key end

     0   :  { %s925_s0 = inlined_call_operand.vmem [shape: f32[45,128], index: 0, kind: input, shape index: {}]   ;;  %s926_s1 = inlined_call_operand.vmem [shape: f32[64,128], index: 1, kind: input, shape index: {}]   ;;  %s927_s2 = inlined_call_operand.vmem [shape: f32[64,128], index: 2, kind: input, shape index: {}]   ;;  %s928_s3 = inlined_call_operand.hbm [shape: f32[1,1], index: 3, kind: output, shape index: {}]  }
   0x1   :  { %v683_v0 = vld [vmem:[%s927_s2] sm:$0xff]  ;;  %v693_v2 = vld [vmem:[%s927_s2 + $0x8] sm:$0xff]  ;;  %v711_v8 = vld [vmem:[%s926_s1 + $0x18] sm:$0xff] }
   0x2   :  { %v688_v1 = vld [vmem:[%s926_s1] sm:$0xff]  ;;  %v124_v3 = vmul.f32 %v683_v0, %v683_v0  ;;  %v702_v5 = vld [vmem:[%s926_s1 + $0x8] sm:$0xff]  ;;  %v125_v6 = vmul.f32 %v693_v2, %v693_v2  ;;  %v716_v9 = vld [vmem:[%s926_s1 + $0x10] sm:$0xff]  ;;  %v79_v10 = vmul.f32 %v711_v8, %v711_v8 }
   0x3   :  { %v76_v4 = vmul.f32 %v688_v1, %v688_v1  ;;  %v77_v7 = vmul.f32 %v702_v5, %v702_v5  ;;  %v78_v11 = vmul.f32 %v716_v9, %v716_v9 }
   0x4   :  { %132 = vadd.xlane.f32.xlu1 %v124_v3 }
   0x5   :  { %84 = vadd.xlane.f32.xlu0 %v76_v4 }
   0x8   :  { %134 = vadd.xlane.f32.xlu1 %v125_v6 }
   0x9   :  { %86 = vadd.xlane.f32.xlu0 %v77_v7 }
   0xa   :  { %8 = vsyncpa [#allocation3], 0  ;;  %v725_v12 = vld [vmem:[%s927_s2 + $0x18] sm:$0xff]  ;;  %v730_v13 = vld [vmem:[%s927_s2 + $0x10] sm:$0xff]  ;;  %vm54_vm0 = vcmask 1044480   ;;  %v657_v45 = vmov 0.0  }
   0xb   :  { %v127_v14 = vmul.f32 %v725_v12, %v725_v12  ;;  %v126_v15 = vmul.f32 %v730_v13, %v730_v13  ;;  %v739_v16 = vld [vmem:[%s926_s1 + $0x28] sm:$0xff]  ;;  %v744_v17 = vld [vmem:[%s926_s1 + $0x20] sm:$0xff]  ;;  %v767_v24 = vld [vmem:[%s926_s1 + $0x38] sm:$0xff]  ;;  %486 = vmatprep.subr.bf16.mxu0 %v657_v45  ;;  %506 = vmatprep.subr.bf16.mxu1 %v657_v45  ;;  %vm658_vm1 = vmmov 0   ;;  %vm368_vm2 = vcmask 523264  }
   0xc   :  { %90 = vadd.xlane.f32.xlu1 %v79_v10  ;;  %v81_v18 = vmul.f32 %v739_v16, %v739_v16  ;;  %v80_v19 = vmul.f32 %v744_v17, %v744_v17  ;;  %v753_v20 = vld [vmem:[%s927_s2 + $0x28] sm:$0xff]  ;;  %v758_v21 = vld [vmem:[%s927_s2 + $0x20] sm:$0xff]  ;;  %v772_v25 = vld [vmem:[%s926_s1 + $0x30] sm:$0xff]  ;;  %v83_v26 = vmul.f32 %v767_v24, %v767_v24  ;;  %494 = vmatprep.mubr.msk.bf16.mxu0 %vm658_vm1, %v657_v45  ;;  %vm384_vm3 = vcmask 520192  }
   0xd   :  { %88 = vadd.xlane.f32.xlu0 %v78_v11  ;;  %v129_v22 = vmul.f32 %v753_v20, %v753_v20  ;;  %v128_v23 = vmul.f32 %v758_v21, %v758_v21  ;;  %v82_v27 = vmul.f32 %v772_v25, %v772_v25  ;;  %v781_v28 = vld [vmem:[%s927_s2 + $0x38] sm:$0xff]  ;;  %v786_v29 = vld [vmem:[%s927_s2 + $0x30] sm:$0xff]  ;;  %v795_v32 = vld [vmem:[%s925_s0 + $0x8] sm:$0xff]  ;;  %514 = vmatprep.mubr.msk.bf16.mxu1 %vm658_vm1, %v657_v45  ;;  %vm456_vm4 = vcmask 0  }
   0xe   :  { %v131_v30 = vmul.f32 %v781_v28, %v781_v28  ;;  %v130_v31 = vmul.f32 %v786_v29, %v786_v29  ;;  %v800_v33 = vld [vmem:[%s925_s0] sm:$0xff]  ;;  %v39_v34 = vmul.f32 %v795_v32, %v795_v32  ;;  %v809_v36 = vld [vmem:[%s925_s0 + $0x18] sm:$0xff]  ;;  %v814_v37 = vld [vmem:[%s925_s0 + $0x10] sm:$0xff] }
   0xf   :  { %v38_v35 = vmul.f32 %v800_v33, %v800_v33  ;;  %v819_v38 = vld [vmem:[%s925_s0 + $0x28] sm:$0x1f]  ;;  %v41_v39 = vmul.f32 %v809_v36, %v809_v36  ;;  %v40_v40 = vmul.f32 %v814_v37, %v814_v37  ;;  %v830_v42 = vld [vmem:[%s925_s0 + $0x20] sm:$0xff]  ;;  %s659_s0 = smov [#allocation2]  }
  0x10   :  { %138 = vadd.xlane.f32.xlu1 %v127_v14  ;;  %v43_v41 = vmul.f32 %v819_v38, %v819_v38  ;;  %v42_v43 = vmul.f32 %v830_v42, %v830_v42  ;;  %s464_s27 = sshll.u32 %s659_s0, 4  ;;  %s465_s27 = int_to_ptr.vmem [resolvable:$true] %s464_s27 }
  0x11   :  { %136 = vadd.xlane.f32.xlu0 %v126_v15  ;;  %s633_s28 = scalar_lea.vmem %s465_s27, 16  ;;  %s637_s29 = scalar_lea.vmem %s465_s27, 32 }
  0x12   :  { %v55_v44 = vsel %vm54_vm0, %v43_v41, 0.0  ;;  %p634_p0 = scmp.ne.s32.totalorder %s465_s27, %s633_s28  ;;  %p638_p1 = scmp.lt.s32.totalorder %s465_s27, %s465_s27 }
  0x13   :  { %p639_p2 = scmp.lt.s32.totalorder %s637_s29, %s633_s28 }
  0x14   :  { %94 = vadd.xlane.f32.xlu1 %v81_v18 }
  0x15   :  { %92 = vadd.xlane.f32.xlu0 %v80_v19  ;;  %p640_p3 = por %p639_p2, %p638_p1 }
  0x17   :  { %p641_p4 = pnand %p640_p3, %p634_p0 }
  0x18   :  { %142 = vadd.xlane.f32.xlu1 %v129_v22 }
  0x19   :  { %140 = vadd.xlane.f32.xlu0 %v128_v23 }
  0x1c   :  { %98 = vadd.xlane.f32.xlu1 %v83_v26 }
  0x1d   :  { %96 = vadd.xlane.f32.xlu0 %v82_v27 }
  0x20   :  { %146 = vadd.xlane.f32.xlu1 %v131_v30 }
  0x21   :  { %144 = vadd.xlane.f32.xlu0 %v130_v31 }
  0x24   :  { %46 = vadd.xlane.f32.xlu1 %v39_v34 }
  0x25   :  { %44 = vadd.xlane.f32.xlu0 %v38_v35 }
  0x28   :  { %50 = vadd.xlane.f32.xlu1 %v41_v39 }
  0x29   :  { %48 = vadd.xlane.f32.xlu0 %v40_v40 }
  0x2c   :  { %56 = vadd.xlane.f32.xlu1 %v55_v44 }
  0x2d   :  { %52 = vadd.xlane.f32.xlu0 %v42_v43 }
  0x91   :  { %v133_v46 = vpop.xlane.xlu1 %132 }
  0x92   :  { %v85_v47 = vpop.xlane.xlu0 %84  ;;  %v148_v48 = vadd.f32 1e-12, %v133_v46 }
  0x93   :  { %v100_v49 = vadd.f32 1e-12, %v85_v47 }
  0x94   :  { %529 = vrsqrt.f32 %v148_v48 }
  0x95   :  { %531 = vrsqrt.f32 %v100_v49  ;;  %v135_v50 = vpop.xlane.xlu1 %134 }
  0x96   :  { %v87_v51 = vpop.xlane.xlu0 %86  ;;  %v149_v52 = vadd.f32 1e-12, %v135_v50 }
  0x97   :  { %v101_v53 = vadd.f32 1e-12, %v87_v51 }
  0x98   :  { %533 = vrsqrt.f32 %v149_v52 }
  0x99   :  { %535 = vrsqrt.f32 %v101_v53  ;;  %v91_v54 = vpop.xlane.xlu1 %90 }
  0x9a   :  { %v89_v55 = vpop.xlane.xlu0 %88  ;;  %v103_v56 = vadd.f32 1e-12, %v91_v54 }
  0x9b   :  { %v102_v57 = vadd.f32 1e-12, %v89_v55 }
  0x9c   :  { %537 = vrsqrt.f32 %v103_v56 }
  0x9d   :  { %539 = vrsqrt.f32 %v102_v57  ;;  %v139_v58 = vpop.xlane.xlu1 %138 }
  0x9e   :  { %v137_v59 = vpop.xlane.xlu0 %136  ;;  %v530_v60 = vpop.eup %529  ;;  %v151_v61 = vadd.f32 1e-12, %v139_v58 }
  0x9f   :  { %v150_v62 = vadd.f32 1e-12, %v137_v59  ;;  %v532_v63 = vpop.eup %531  ;;  %v164_v6 = vmul.f32 %v530_v60, %v683_v0 }
  0xa0   :  { %541 = vrsqrt.f32 %v151_v61  ;;  %v116_v14 = vmul.f32 %v532_v63, %v688_v1 }
  0xa1   :  { %543 = vrsqrt.f32 %v150_v62  ;;  %v95_v3 = vpop.xlane.xlu1 %94  ;;  %v180_v26 = vmul.f32 2.0, %v164_v6 }
  0xa2   :  { %v93_v4 = vpop.xlane.xlu0 %92  ;;  %v534_v7 = vpop.eup %533  ;;  %v105_v10 = vadd.f32 1e-12, %v95_v3  ;;  %v845_v0 = vmul.f32 2.0, %v116_v14 }
  0xa3   :  { %v104_v11 = vadd.f32 1e-12, %v93_v4  ;;  %v536_v15 = vpop.eup %535  ;;  %v165_v18 = vmul.f32 %v534_v7, %v693_v2 }
  0xa4   :  { %545 = vrsqrt.f32 %v105_v10  ;;  %v117_v19 = vmul.f32 %v536_v15, %v702_v5 }
  0xa5   :  { %547 = vrsqrt.f32 %v104_v11  ;;  %v143_v22 = vpop.xlane.xlu1 %142  ;;  %v181_v27 = vmul.f32 2.0, %v165_v18 }
  0xa6   :  { %v141_v23 = vpop.xlane.xlu0 %140  ;;  %v538_v30 = vpop.eup %537  ;;  %v153_v31 = vadd.f32 1e-12, %v143_v22  ;;  %v847_v35 = vmul.f32 2.0, %v117_v19 }
  0xa7   :  { %v152_v34 = vadd.f32 1e-12, %v141_v23  ;;  %v540_v39 = vpop.eup %539  ;;  %v295_v1 = vpack.c.bf16 %v181_v27, %v180_v26  ;;  %v119_v40 = vmul.f32 %v538_v30, %v711_v8 }
  0xa8   :  { %549 = vrsqrt.f32 %v153_v31  ;;  %v222_v2 = vpack.c.bf16 %v847_v35, %v845_v0  ;;  %v118_v5 = vmul.f32 %v540_v39, %v716_v9 }
  0xa9   :  { %551 = vrsqrt.f32 %v152_v34  ;;  %507 = vmatpush3.bf16.xpose.msra.mxu1 %v295_v1  ;;  %v99_v41 = vpop.xlane.xlu1 %98  ;;  %v858_v9 = vmul.f32 2.0, %v119_v40 }
  0xaa   :  { %v97_v43 = vpop.xlane.xlu0 %96  ;;  %v542_v44 = vpop.eup %541  ;;  %v107_v46 = vadd.f32 1e-12, %v99_v41  ;;  %487 = vmatpush3.bf16.xpose.msra.mxu0 %v222_v2  ;;  %508 = vmatprep.subr.bf16.mxu1 %v657_v45  ;;  %v856_v50 = vmul.f32 2.0, %v118_v5 }
  0xab   :  { %v106_v47 = vadd.f32 1e-12, %v97_v43  ;;  %v544_v48 = vpop.eup %543  ;;  %488 = vmatprep.subr.bf16.mxu0 %v657_v45  ;;  %v167_v49 = vmul.f32 %v542_v44, %v725_v12 }
  0xac   :  { %553 = vrsqrt.f32 %v107_v46  ;;  %v166_v8 = vmul.f32 %v544_v48, %v730_v13  ;;  %v223_v12 = vpack.c.bf16 %v858_v9, %v856_v50 }
  0xad   :  { %555 = vrsqrt.f32 %v106_v47  ;;  %v147_v51 = vpop.xlane.xlu1 %146  ;;  %v183_v53 = vmul.f32 2.0, %v167_v49 }
  0xae   :  { %v145_v52 = vpop.xlane.xlu0 %144  ;;  %v546_v54 = vpop.eup %545  ;;  %v155_v55 = vadd.f32 1e-12, %v147_v51  ;;  %v182_v57 = vmul.f32 2.0, %v166_v8 }
  0xaf   :  { %v154_v56 = vadd.f32 1e-12, %v145_v52  ;;  %v548_v58 = vpop.eup %547  ;;  %v121_v59 = vmul.f32 %v546_v54, %v739_v16 }
  0xb0   :  { %557 = vrsqrt.f32 %v155_v55  ;;  %v296_v60 = vpack.c.bf16 %v183_v53, %v182_v57  ;;  %v120_v61 = vmul.f32 %v548_v58, %v744_v17 }
  0xb1   :  { %559 = vrsqrt.f32 %v154_v56  ;;  %v47_v13 = vpop.xlane.xlu1 %46  ;;  %v869_v7 = vmul.f32 2.0, %v121_v59 }
  0xb2   :  { %v45_v62 = vpop.xlane.xlu0 %44  ;;  %v550_v63 = vpop.eup %549  ;;  %489 = vmatpush3.bf16.xpose.msra.mxu0 %v223_v12  ;;  %509 = vmatpush3.bf16.xpose.msra.mxu1 %v296_v60  ;;  %v59_v3 = vadd.f32 1e-12, %v47_v13  ;;  %v867_v16 = vmul.f32 2.0, %v120_v61 }
  0xb3   :  { %v58_v4 = vadd.f32 1e-12, %v45_v62  ;;  %v552_v6 = vpop.eup %551  ;;  %490 = vmatprep.subr.bf16.mxu0 %v657_v45  ;;  %510 = vmatprep.subr.bf16.mxu1 %v657_v45  ;;  %v169_v10 = vmul.f32 %v550_v63, %v753_v20 }
  0xb4   :  { %561 = vrsqrt.f32 %v59_v3  ;;  %v168_v17 = vmul.f32 %v552_v6, %v758_v21  ;;  %v224_v27 = vpack.c.bf16 %v869_v7, %v867_v16 }
  0xb5   :  { %563 = vrsqrt.f32 %v58_v4  ;;  %v51_v11 = vpop.xlane.xlu1 %50  ;;  %v185_v15 = vmul.f32 2.0, %v169_v10 }
  0xb6   :  { %v49_v14 = vpop.xlane.xlu0 %48  ;;  %v554_v18 = vpop.eup %553  ;;  %v61_v19 = vadd.f32 1e-12, %v51_v11  ;;  %v184_v23 = vmul.f32 2.0, %v168_v17 }
  0xb7   :  { %v60_v22 = vadd.f32 1e-12, %v49_v14  ;;  %v556_v26 = vpop.eup %555  ;;  %v123_v20 = vmul.f32 %v554_v18, %v767_v24 }
  0xb8   :  { %565 = vrsqrt.f32 %v61_v19  ;;  %v297_v30 = vpack.c.bf16 %v185_v15, %v184_v23  ;;  %v122_v31 = vmul.f32 %v556_v26, %v772_v25 }
  0xb9   :  { %567 = vrsqrt.f32 %v60_v22  ;;  %v57_v21 = vpop.xlane.xlu1 %56  ;;  %v179_v25 = vmul.f32 2.0, %v123_v20 }
  0xba   :  { %v53_v34 = vpop.xlane.xlu0 %52  ;;  %v558_v39 = vpop.eup %557  ;;  %491 = vmatpush3.bf16.xpose.msra.mxu0 %v224_v27  ;;  %511 = vmatpush3.bf16.xpose.msra.mxu1 %v297_v30  ;;  %v63_v1 = vadd.f32 1e-12, %v57_v21  ;;  %v178_v41 = vmul.f32 2.0, %v122_v31 }
  0xbb   :  { %v62_v2 = vadd.f32 1e-12, %v53_v34  ;;  %v560_v5 = vpop.eup %559  ;;  %492 = vmatprep.subr.bf16.mxu0 %v657_v45  ;;  %512 = vmatprep.subr.bf16.mxu1 %v657_v45  ;;  %v171_v40 = vmul.f32 %v558_v39, %v781_v28 }
  0xbc   :  { %569 = vrsqrt.f32 %v63_v1  ;;  %v170_v24 = vmul.f32 %v560_v5, %v786_v29  ;;  %v225_v49 = vpack.c.bf16 %v179_v25, %v178_v41 }
  0xbd   :  { %571 = vrsqrt.f32 %v62_v2  ;;  %v187_v43 = vmul.f32 2.0, %v171_v40 }
  0xbe   :  { %v562_v44 = vpop.eup %561  ;;  %v186_v46 = vmul.f32 2.0, %v170_v24 }
  0xbf   :  { %v564_v47 = vpop.eup %563  ;;  %v71_v48 = vmul.f32 %v562_v44, %v795_v32 }
  0xc0   :  { %v298_v8 = vpack.c.bf16 %v187_v43, %v186_v46  ;;  %v70_v51 = vmul.f32 %v564_v47, %v800_v33 }
  0xc1   :  { %v189_v52 = vmul.f32 %v847_v35, %v71_v48 }
  0xc2   :  { %v566_v53 = vpop.eup %565  ;;  %493 = vmatpush3.bf16.xpose.msra.mxu0 %v225_v49  ;;  %513 = vmatpush3.bf16.xpose.msra.mxu1 %v298_v8  ;;  %v188_v28 = vmul.f32 %v845_v0, %v70_v51  ;;  %v219_v56 = vpack.c.bf16 %v71_v48, %v70_v51 }
  0xc3   :  { %v568_v54 = vpop.eup %567  ;;  %196 = vadd.xlane.f32.xlu1 %v189_v52  ;;  %v73_v29 = vmul.f32 %v566_v53, %v809_v36 }
  0xc4   :  { %194 = vadd.xlane.f32.xlu0 %v188_v28  ;;  %v72_v55 = vmul.f32 %v568_v54, %v814_v37 }
  0xc5   :  { %v191_v32 = vmul.f32 %v858_v9, %v73_v29 }
  0xc6   :  { %v570_v57 = vpop.eup %569  ;;  %v190_v33 = vmul.f32 %v856_v50, %v72_v55 }
  0xc7   :  { %v572_v58 = vpop.eup %571  ;;  %200 = vadd.xlane.f32.xlu1 %v191_v32  ;;  %v75_v35 = vmul.f32 %v570_v57, %v819_v38  ;;  %v220_v38 = vpack.c.bf16 %v73_v29, %v72_v55 }
  0xc8   :  { %198 = vadd.xlane.f32.xlu0 %v190_v33  ;;  %v74_v0 = vmul.f32 %v572_v58, %v830_v42 }
  0xc9   :  { %495 = vmatmul.mubr.bf16.vlgmr.msra.gmra.mrb[0].mxu0 %v219_v56  ;;  %515 = vmatmul.mubr.bf16.vlgmr.msra.gmra.mrb[0].mxu1 %v219_v56  ;;  %v193_v36 = vmul.f32 %v869_v7, %v75_v35 }
  0xca   :  { %v192_v59 = vmul.f32 %v867_v16, %v74_v0  ;;  %498 = vmatprep.mubr.msk.bf16.mxu0 %vm658_vm1, %v657_v45  ;;  %518 = vmatprep.mubr.msk.bf16.mxu1 %vm658_vm1, %v657_v45  ;;  %v221_v42 = vpack.c.bf16 %v75_v35, %v74_v0 }
  0xcb   :  { %v204_v37 = vsel %vm54_vm0, %v193_v36, 0.0 }
  0xcc   :  { %202 = vadd.xlane.f32.xlu0 %v192_v59  ;;  %205 = vadd.xlane.f32.xlu1 %v204_v37 }
  0xd1   :  { %499 = vmatmul.mubr.bf16.gmra.mrb[4].mxu0 %v220_v38  ;;  %519 = vmatmul.mubr.bf16.gmra.mrb[4].mxu1 %v220_v38 }
  0xd2   :  { %502 = vmatprep.mubr.msk.bf16.mxu0 %vm658_vm1, %v657_v45  ;;  %522 = vmatprep.mubr.msk.bf16.mxu1 %vm658_vm1, %v657_v45 }
  0xd9   :  { %503 = vmatmul.mubr.bf16.gmra.mrb[8].mxu0 %v221_v42  ;;  %523 = vmatmul.mubr.bf16.gmra.mrb[8].mxu1 %v221_v42 }
 0x150   :  { %v197_v37 = vpop.xlane.xlu1 %196 }
 0x151   :  { %v195_v59 = vpop.xlane.xlu0 %194 }
 0x154   :  { %v201_v42 = vpop.xlane.xlu1 %200 }
 0x155   :  { %v199_v38 = vpop.xlane.xlu0 %198 }
 0x19c   :  { %v260_v50 = vpop.f32.mrb[0].mxu0  ;;  %v333_v9 = vpop.f32.mrb[0].mxu1 }
 0x19d   :  { %v283_v12 = vmul.f32 1.442695, %v260_v50  ;;  %v356_v60 = vmul.f32 1.442695, %v333_v9  ;;  %v496_v61 = vpop.f32.mrb[1].mxu0  ;;  %v516_v13 = vpop.f32.mrb[1].mxu1 }
 0x19e   :  { %v263_v62 = vpop.f32.mrb[2].mxu0  ;;  %v336_v63 = vpop.f32.mrb[2].mxu1  ;;  %v209_v61 = vmul.f32 1.442695, %v197_v37 }
 0x19f   :  { %573 = vpow2.f32 %v283_v12  ;;  %v285_v3 = vmul.f32 1.442695, %v263_v62  ;;  %v358_v4 = vmul.f32 1.442695, %v336_v63  ;;  %v497_v6 = vpop.f32.mrb[3].mxu0  ;;  %v517_v16 = vpop.f32.mrb[3].mxu1 }
 0x1a0   :  { %575 = vpow2.f32 %v356_v60  ;;  %v203_v50 = vpop.xlane.xlu0 %202  ;;  %v206_v9 = vpop.xlane.xlu1 %205  ;;  %v211_v6 = vmul.f32 1.442695, %v199_v38 }
 0x1a1   :  { %577 = vpow2.f32 %v285_v3  ;;  %v207_v3 = vmul.f32 1.442695, %v195_v59 }
 0x1a2   :  { %579 = vpow2.f32 %v358_v4 }
 0x1a4   :  { %v268_v45 = vpop.f32.mrb[4].mxu0  ;;  %v341_v7 = vpop.f32.mrb[4].mxu1 }
 0x1a5   :  { %v287_v10 = vmul.f32 1.442695, %v268_v45  ;;  %v360_v17 = vmul.f32 1.442695, %v341_v7  ;;  %v500_v11 = vpop.f32.mrb[5].mxu0  ;;  %v520_v14 = vpop.f32.mrb[5].mxu1 }
 0x1a6   :  { %v271_v15 = vpop.f32.mrb[6].mxu0  ;;  %v344_v18 = vpop.f32.mrb[6].mxu1 }
 0x1a7   :  { %581 = vpow2.f32 %v287_v10  ;;  %v289_v19 = vmul.f32 1.442695, %v271_v15  ;;  %v362_v22 = vmul.f32 1.442695, %v344_v18  ;;  %v501_v23 = vpop.f32.mrb[7].mxu0  ;;  %v521_v26 = vpop.f32.mrb[7].mxu1 }
 0x1a8   :  { %583 = vpow2.f32 %v360_v17  ;;  %v213_v10 = vmul.f32 1.442695, %v201_v42  ;;  %v215_v15 = vmul.f32 1.442695, %v203_v50 }
 0x1a9   :  { %v574_v27 = vpop.eup %573  ;;  %585 = vpow2.f32 %v289_v19 }
 0x1aa   :  { %v576_v30 = vpop.eup %575  ;;  %v369_v31 = vsel %vm368_vm2, %v574_v27, 0.0  ;;  %587 = vpow2.f32 %v362_v22  ;;  %v217_v27 = vmul.f32 1.442695, %v206_v9 }
 0x1ab   :  { %v578_v20 = vpop.eup %577  ;;  %370 = vadd.xlane.f32.xlu0 %v369_v31  ;;  %v388_v43 = vsel %vm368_vm2, %v576_v30, 0.0 }
 0x1ac   :  { %v276_v21 = vpop.f32.mrb[8].mxu0  ;;  %v349_v34 = vpop.f32.mrb[8].mxu1  ;;  %v372_v39 = vsel %vm368_vm2, %v578_v20, 0.0 }
 0x1ad   :  { %v580_v1 = vpop.eup %579  ;;  %v291_v2 = vmul.f32 1.442695, %v276_v21  ;;  %v364_v5 = vmul.f32 1.442695, %v349_v34  ;;  %373 = vadd.xlane.f32.xlu1 %v372_v39  ;;  %v504_v40 = vpop.f32.mrb[9].mxu0 }
 0x1ae   :  { %v524_v41 = vpop.f32.mrb[9].mxu1  ;;  %v279_v25 = vpop.f32.mrb[10].mxu0  ;;  %v391_v49 = vsel %vm368_vm2, %v580_v1, 0.0 }
 0x1af   :  { %v352_v24 = vpop.f32.mrb[10].mxu1  ;;  %589 = vpow2.f32 %v291_v2  ;;  %v293_v44 = vmul.f32 1.442695, %v279_v25  ;;  %v505_v47 = vpop.f32.mrb[11].mxu0  ;;  %389 = vadd.xlane.f32.xlu0 %v388_v43 }
 0x1b0   :  { %v366_v46 = vmul.f32 1.442695, %v352_v24  ;;  %v525_v48 = vpop.f32.mrb[11].mxu1  ;;  %591 = vpow2.f32 %v364_v5 }
 0x1b1   :  { %v582_v8 = vpop.eup %581  ;;  %392 = vadd.xlane.f32.xlu1 %v391_v49  ;;  %593 = vpow2.f32 %v293_v44 }
 0x1b2   :  { %v584_v51 = vpop.eup %583  ;;  %v375_v52 = vsel %vm368_vm2, %v582_v8, 0.0  ;;  %595 = vpow2.f32 %v366_v46 }
 0x1b3   :  { %v394_v53 = vsel %vm368_vm2, %v584_v51, 0.0  ;;  %v586_v28 = vpop.eup %585  ;;  %597 = vpow2.f32 %v209_v61 }
 0x1b4   :  { %395 = vadd.xlane.f32.xlu0 %v394_v53  ;;  %v588_v54 = vpop.eup %587  ;;  %v378_v29 = vsel %vm368_vm2, %v586_v28, 0.0 }
 0x1b5   :  { %376 = vadd.xlane.f32.xlu1 %v375_v52  ;;  %v397_v55 = vsel %vm368_vm2, %v588_v54, 0.0 }
 0x1b8   :  { %379 = vadd.xlane.f32.xlu0 %v378_v29 }
 0x1b9   :  { %v590_v32 = vpop.eup %589  ;;  %398 = vadd.xlane.f32.xlu1 %v397_v55 }
 0x1ba   :  { %v592_v56 = vpop.eup %591  ;;  %v381_v57 = vsel %vm368_vm2, %v590_v32, 0.0 }
 0x1bb   :  { %v400_v33 = vsel %vm368_vm2, %v592_v56, 0.0  ;;  %v594_v58 = vpop.eup %593 }
 0x1bc   :  { %401 = vadd.xlane.f32.xlu0 %v400_v33  ;;  %v596_v35 = vpop.eup %595  ;;  %v385_v0 = vsel %vm384_vm3, %v594_v58, 0.0 }
 0x1bd   :  { %382 = vadd.xlane.f32.xlu1 %v381_v57  ;;  %v403_v36 = vsel %vm384_vm3, %v596_v35, 0.0  ;;  %v598_v18 = vpop.eup %597 }
 0x1c0   :  { %386 = vadd.xlane.f32.xlu0 %v385_v0 }
 0x1c1   :  { %404 = vadd.xlane.f32.xlu1 %v403_v36 }
 0x238   :  { %v371_v12 = vpop.xlane.xlu0 %370 }
 0x23a   :  { %v374_v60 = vpop.xlane.xlu1 %373 }
 0x23c   :  { %v390_v13 = vpop.xlane.xlu0 %389 }
 0x23d   :  { %v406_v62 = vadd.f32 %v390_v13, %v371_v12 }
 0x23e   :  { %v393_v63 = vpop.xlane.xlu1 %392 }
 0x23f   :  { %v407_v4 = vadd.f32 %v393_v63, %v374_v60  ;;  %599 = vrcp.f32 %v406_v62 }
 0x241   :  { %601 = vrcp.f32 %v407_v4  ;;  %v396_v16 = vpop.xlane.xlu0 %395 }
 0x242   :  { %v377_v45 = vpop.xlane.xlu1 %376  ;;  %603 = vpow2.f32 %v207_v3 }
 0x243   :  { %v408_v7 = vadd.f32 %v396_v16, %v377_v45  ;;  %605 = vpow2.f32 %v211_v6 }
 0x245   :  { %607 = vrcp.f32 %v408_v7  ;;  %v380_v17 = vpop.xlane.xlu0 %379 }
 0x246   :  { %v399_v11 = vpop.xlane.xlu1 %398  ;;  %609 = vpow2.f32 %v213_v10 }
 0x247   :  { %v409_v14 = vadd.f32 %v399_v11, %v380_v17 }
 0x249   :  { %611 = vrcp.f32 %v409_v14  ;;  %v402_v19 = vpop.xlane.xlu0 %401  ;;  %v600_v22 = vpop.eup %599 }
 0x24a   :  { %v383_v23 = vpop.xlane.xlu1 %382  ;;  %613 = vpow2.f32 %v215_v15 }
 0x24b   :  { %v602_v26 = vpop.eup %601  ;;  %v410_v30 = vadd.f32 %v402_v19, %v383_v23 }
 0x24c   :  { %v419_v31 = vmul.f32 %v602_v26, %v598_v18  ;;  %v604_v20 = vpop.eup %603 }
 0x24d   :  { %615 = vrcp.f32 %v410_v30  ;;  %v606_v21 = vpop.eup %605  ;;  %v418_v34 = vmul.f32 %v604_v20, %v600_v22  ;;  %v387_v39 = vpop.xlane.xlu0 %386 }
 0x24e   :  { %v405_v1 = vpop.xlane.xlu1 %404  ;;  %617 = vpow2.f32 %v217_v27 }
 0x24f   :  { %v608_v2 = vpop.eup %607  ;;  %v411_v5 = vadd.f32 %v405_v1, %v387_v39  ;;  %619 = vlog2.f32 %v419_v31 }
 0x250   :  { %v420_v40 = vmul.f32 %v608_v2, %v606_v21  ;;  %v610_v41 = vpop.eup %609 }
 0x251   :  { %621 = vrcp.f32 %v411_v5 }
 0x252   :  { %623 = vlog2.f32 %v418_v34 }
 0x253   :  { %v612_v25 = vpop.eup %611  ;;  %625 = vlog2.f32 %v420_v40 }
 0x254   :  { %v421_v24 = vmul.f32 %v612_v25, %v610_v41  ;;  %v614_v43 = vpop.eup %613 }
 0x256   :  { %627 = vlog2.f32 %v421_v24 }
 0x257   :  { %v616_v44 = vpop.eup %615 }
 0x258   :  { %v422_v46 = vmul.f32 %v616_v44, %v614_v43  ;;  %v618_v47 = vpop.eup %617 }
 0x259   :  { %v620_v48 = vpop.eup %619 }
 0x25a   :  { %629 = vlog2.f32 %v422_v46  ;;  %v427_v53 = vmul.f32 0.6931472, %v620_v48 }
 0x25b   :  { %v622_v49 = vpop.eup %621 }
 0x25c   :  { %v624_v8 = vpop.eup %623  ;;  %v423_v51 = vmul.f32 %v622_v49, %v618_v47  ;;  %v437_v55 = vsub.f32 0.0, %v427_v53 }
 0x25d   :  { %v626_v52 = vpop.eup %625  ;;  %v425_v54 = vmul.f32 0.6931472, %v624_v8 }
 0x25e   :  { %631 = vlog2.f32 %v423_v51  ;;  %v429_v29 = vmul.f32 0.6931472, %v626_v52 }
 0x25f   :  { %v436_v57 = vsub.f32 0.0, %v425_v54 }
 0x260   :  { %v628_v28 = vpop.eup %627  ;;  %v438_v33 = vsub.f32 0.0, %v429_v29 }
 0x261   :  { %v431_v32 = vmul.f32 0.6931472, %v628_v28  ;;  %v442_v35 = vadd.f32 %v437_v55, %v436_v57 }
 0x263   :  { %v439_v0 = vsub.f32 0.0, %v431_v32  ;;  %v443_v37 = vadd.f32 %v442_v35, %v438_v33 }
 0x264   :  { %v630_v56 = vpop.eup %629 }
 0x265   :  { %v433_v58 = vmul.f32 0.6931472, %v630_v56  ;;  %v444_v42 = vadd.f32 %v443_v37, %v439_v0 }
 0x267   :  { %v440_v59 = vsub.f32 0.0, %v433_v58 }
 0x268   :  { %v632_v36 = vpop.eup %631 }
 0x269   :  { %v435_v38 = vmul.f32 0.6931472, %v632_v36  ;;  %v445_v9 = vadd.f32 %v444_v42, %v440_v59 }
 0x26b   :  { %v441_v50 = vsub.f32 0.0, %v435_v38 }
 0x26d   :  { %v446_v12 = vsel %vm54_vm0, %v441_v50, 0.0 }
 0x26e   :  { %v447_v60 = vadd.f32 %v446_v12, %v445_v9 }
 0x270   :  { %v448_v61 = vrot.slane %v447_v60, 4 }
 0x272   :  { %v449_v13 = vadd.f32 %v448_v61, %v447_v60 }
 0x274   :  { %v450_v62 = vrot.slane %v449_v13, 2 }
 0x276   :  { %v451_v63 = vadd.f32 %v450_v62, %v449_v13 }
 0x278   :  { %v452_v3 = vrot.slane %v451_v63, 1 }
 0x27a   :  { %v453_v4 = vadd.f32 %v452_v3, %v451_v63 }
 0x27c   :  { %v455_v6 = vmul.f32 0.022222223, %v453_v4 }
 0x27e   :  { %457 = vst.msk [vmem:[#allocation2] sm:$0x1] %vm456_vm4, %v455_v6 }
 0x27f   :  { %644 = shalt.err (!%p641_p4)
}
 0x280   :  { %s645_s5 = scalar_lea.hbm %s928_s3, 16 }
 0x281   :  { %p646_p5 = scmp.ne.s32.totalorder %s928_s3, %s645_s5  ;;  %p649_p6 = scmp.lt.u32.totalorder %s645_s5, %s928_s3 }
 0x283   :  { %p651_p7 = pnand %p649_p6, %p646_p5 }
 0x285   :  { %654 = shalt.err (!%p651_p7)
}
 0x286   :  { %467 = dma.vmem_to_hbm [thread:$0]  %s465_s27, 16, %s928_s3, [#allocation3]  }
 0x287   :  { %655 = dma.done.wait [#allocation3], 16  }
 0x288   :  { %656 = vsyncadd [#allocation3], 4294967280 }
 0x289   :  { %471 = vsyncpa [#allocation3], 1 }

// kernel: premodel_forward.6
= control target key start
LH: loop header
LB: loop body
LE: loop exit
PB: predicated region body
PF: predicated region fallthrough
CT: control target
= control target key end

     0   :  { %s1096_s21 = smov 0   ;;  %s1200_s0 = inlined_call_operand.vmem [shape: bf16[3,64,64], index: 0, kind: input, shape index: {}]   ;;  %s1201_s1 = inlined_call_operand.vmem [shape: bf16[3,64,128], index: 1, kind: input, shape index: {}]   ;;  %s1202_s2 = inlined_call_operand.vmem [shape: bf16[128,128], index: 2, kind: input, shape index: {}]   ;;  %s1203_s3 = inlined_call_operand.vmem [shape: f32[1,128], index: 3, kind: input, shape index: {}]   ;;  %s1204_s4 = inlined_call_operand.vmem [shape: bf16[128,128], index: 4, kind: input, shape index: {}]   ;;  %s1205_s5 = inlined_call_operand.vmem [shape: f32[1,128], index: 5, kind: input, shape index: {}]   ;;  %s1206_s6 = inlined_call_operand.vmem [shape: f32[3,64,128], index: 6, kind: output, shape index: {}]  }
   0x1 LB: > { %s851_s22 = sadd.s32 4294967295, %s1059_s21   ;;  %p855_p0 = scmp.ge.s32.totalorder %s1059_s21, 1  ;;  %s1059_s21 = sphi %s1096_s21, %s16_s21  }
   0x2   : > { %p222_p1 = scmp.lt.s32.totalorder %s1059_s21, 4 }
   0x4   : > { %p223_p2 = pnand %p855_p0, %p222_p1 }
   0x5   : > { %v1029_v0 = vld [vmem:[%s1202_s2] sm:$0xff] (!%p223_p2)   ;;  %p257_p3 = scmp.lt.s32.totalorder (!%p223_p2), %s851_s22, 2  ;;  %v1030_v1 = vld [vmem:[%s1202_s2 + $0x8] sm:$0xff] (!%p223_p2)   ;;  %v1031_v2 = vld [vmem:[%s1202_s2 + $0x10] sm:$0xff] (!%p223_p2)   ;;  %vm473_vm0 = vcmask (!%p223_p2), 523264  }
   0x6   : > { %226 = sbr.rel (%p223_p2) target bundleno = 954 (0x3ba), region = 44  ;;  %941 = vmatprep.subr.bf16.mxu0 (!%p223_p2), %v1029_v0  ;;  %v1032_v3 = vld [vmem:[%s1202_s2 + $0x18] sm:$0xff] (!%p223_p2)   ;;  %v1033_v5 = vld [vmem:[%s1202_s2 + $0x20] sm:$0xff] (!%p223_p2)   ;;  %v1034_v6 = vld [vmem:[%s1202_s2 + $0x28] sm:$0xff] (!%p223_p2)  }
   0x7   : > { %942 = vmatpush3.bf16.msra.mxu0 (!%p223_p2), %v1029_v0  ;;  %v1035_v7 = vld [vmem:[%s1202_s2 + $0x30] sm:$0xff] (!%p223_p2)   ;;  %v1036_v8 = vld [vmem:[%s1202_s2 + $0x38] sm:$0xff] (!%p223_p2)   ;;  %v1045_v25 = vld [vmem:[%s1204_s4] sm:$0xff] (!%p223_p2)  }
   0x8   : > { %943 = vmatprep.subr.bf16.mxu0 (!%p223_p2), %v1030_v1  ;;  %v1046_v28 = vld [vmem:[%s1204_s4 + $0x8] sm:$0xff] (!%p223_p2)   ;;  %v1047_v29 = vld [vmem:[%s1204_s4 + $0x10] sm:$0xff] (!%p223_p2)   ;;  %v1048_v31 = vld [vmem:[%s1204_s4 + $0x18] sm:$0xff] (!%p223_p2)  }
   0x9   : > { %v1049_v32 = vld [vmem:[%s1204_s4 + $0x20] sm:$0xff] (!%p223_p2)   ;;  %v1050_v33 = vld [vmem:[%s1204_s4 + $0x28] sm:$0xff] (!%p223_p2)   ;;  %v1051_v34 = vld [vmem:[%s1204_s4 + $0x30] sm:$0xff] (!%p223_p2)  }
   0xa   : > { %v1052_v35 = vld [vmem:[%s1204_s4 + $0x38] sm:$0xff] (!%p223_p2)   ;;  %v874_v36 = vld [vmem:[%s1203_s3] ss:$0 sm:$0xff] (!%p223_p2) }
   0xb   : > { %944 = vmatpush3.bf16.msra.mxu0 (!%p223_p2), %v1030_v1 }
   0xc   : > { %945 = vmatprep.subr.bf16.mxu0 (!%p223_p2), %v1031_v2 }
   0xd   : > { %s1208_s22 = smov (!%p257_p3, %s851_s22), 2 }
   0xe   : > { %s898_s29 = sshll.u32 %s1208_s22, 5  ;;  %s900_s20 = sshll.u32 %s1208_s22, 6 }
   0xf   : > { %s266_s8 = scalar_lea.vmem %s1201_s1, %s898_s29  ;;  %946 = vmatpush3.bf16.msra.mxu0 %v1031_v2  ;;  %s1137_s23 = scalar_lea.vmem %s1200_s0, %s898_s29 }
  0x10   : > { %v1037_v4 = vld [vmem:[%s266_s8] sm:$0xff]   ;;  %947 = vmatprep.subr.bf16.mxu0 %v1032_v3  ;;  %v1038_v9 = vld [vmem:[%s266_s8 + $0x8] sm:$0xff]   ;;  %v1039_v10 = vld [vmem:[%s266_s8 + $0x10] sm:$0xff]   ;;  %s271_s25 = scalar_lea.vmem %s1206_s6, %s900_s20 }
  0x11   : > { %957 = vmatprep.mubr.bf16.mxu0 %v1037_v4  ;;  %v1040_v11 = vld [vmem:[%s266_s8 + $0x18] sm:$0xff]   ;;  %v1041_v12 = vld [vmem:[%s1137_s23] sm:$0xff]   ;;  %v1146_v26 = vld [vmem:[%s1137_s23 + $0x8] sm:$0xff]  }
  0x12   : > { %973 = vmatprep.mubr.msk.bf16.mxu1 %vm473_vm0, %v1041_v12  ;;  %v1149_v27 = vld [vmem:[%s1137_s23 + $0x10] sm:$0xff]   ;;  %v1162_v30 = vld [vmem:[%s1137_s23 + $0x18] sm:$0xff]  }
  0x13   : > { %948 = vmatpush3.bf16.msra.mxu0 %v1032_v3 }
  0x14   : > { %949 = vmatprep.subr.bf16.mxu0 %v1033_v5 }
  0x17   : > { %950 = vmatpush3.bf16.msra.mxu0 %v1033_v5 }
  0x18   : > { %951 = vmatprep.subr.bf16.mxu0 %v1034_v6 }
  0x1b   : > { %952 = vmatpush3.bf16.msra.mxu0 %v1034_v6 }
  0x1c   : > { %953 = vmatprep.subr.bf16.mxu0 %v1035_v7 }
  0x1f   : > { %954 = vmatpush3.bf16.msra.mxu0 %v1035_v7 }
  0x20   : > { %955 = vmatprep.subr.bf16.mxu0 %v1036_v8 }
  0x23   : > { %956 = vmatpush3.bf16.msra.mxu0 %v1036_v8 }
  0x26   : > { %958 = vmatmul.mubr.bf16.vlgmr.msra.gmra.mrb[0].mxu0 %v1038_v9 }
  0x27   : > { %961 = vmatprep.mubr.bf16.mxu0 %v1039_v10 }
  0x2e   : > { %962 = vmatmul.mubr.bf16.gmra.mrb[4].mxu0 %v1040_v11 }
  0x2f   : > { %1013 = vmatprep.mubr.msk.bf16.mxu0 %vm473_vm0, %v1041_v12 }
  0xf9   : > { %v959_v13 = vpop.f32.mrb[0].mxu0 }
  0xfa   : > { %v412_v14 = vpop.f32.mrb[1].mxu0 }
  0xfb   : > { %v960_v15 = vpop.f32.mrb[2].mxu0 }
  0xfc   : > { %v444_v16 = vpack.c.bf16 %v960_v15, %v959_v13  ;;  %v415_v17 = vpop.f32.mrb[3].mxu0  ;;  %v891_v13 = vld [vmem:[%s1205_s5] ss:$0 sm:$0xff] }
  0xfd   : > { %v443_v18 = vpack.c.bf16 %v415_v17, %v412_v14 }
  0xff   : > { %965 = vmatprep.subr.bf16.mxu1 %v443_v18 }
 0x100   : > { %966 = vmatpush3.bf16.msra.mxu1 %v443_v18 }
 0x101   : > { %v963_v19 = vpop.f32.mrb[4].mxu0  ;;  %967 = vmatprep.subr.bf16.mxu1 %v444_v16 }
 0x102   : > { %v428_v20 = vpop.f32.mrb[5].mxu0 }
 0x103   : > { %v964_v21 = vpop.f32.mrb[6].mxu0 }
 0x104   : > { %v446_v22 = vpack.c.bf16 %v964_v21, %v963_v19  ;;  %v431_v23 = vpop.f32.mrb[7].mxu0  ;;  %968 = vmatpush3.bf16.msra.mxu1 %v444_v16 }
 0x105   : > { %v445_v24 = vpack.c.bf16 %v431_v23, %v428_v20 }
 0x107   : > { %969 = vmatprep.subr.bf16.mxu1 %v445_v24 }
 0x108   : > { %970 = vmatpush3.bf16.msra.mxu1 %v445_v24 }
 0x109   : > { %971 = vmatprep.subr.bf16.mxu1 %v446_v22 }
 0x10c   : > { %972 = vmatpush3.bf16.msra.mxu1 %v446_v22 }
 0x10d   : > { %981 = vmatprep.subr.bf16.mxu1 %v1045_v25 }
 0x10f   : > { %974 = vmatmul.mubr.msk.bf16.vlgmr.msra.gmra.mrb[0].mxu1 %vm473_vm0, %v1146_v26 }
 0x110   : > { %977 = vmatprep.mubr.msk.bf16.mxu1 %vm473_vm0, %v1149_v27  ;;  %982 = vmatpush3.bf16.msra.mxu1 %v1045_v25 }
 0x111   : > { %983 = vmatprep.subr.bf16.mxu1 %v1046_v28 }
 0x114   : > { %984 = vmatpush3.bf16.msra.mxu1 %v1046_v28 }
 0x115   : > { %985 = vmatprep.subr.bf16.mxu1 %v1047_v29 }
 0x117   : > { %978 = vmatmul.mubr.msk.bf16.gmra.mrb[4].mxu1 %vm473_vm0, %v1162_v30 }
 0x118   : > { %986 = vmatpush3.bf16.msra.mxu1 %v1047_v29 }
 0x119   : > { %987 = vmatprep.subr.bf16.mxu1 %v1048_v31 }
 0x11c   : > { %988 = vmatpush3.bf16.msra.mxu1 %v1048_v31 }
 0x11d   : > { %989 = vmatprep.subr.bf16.mxu1 %v1049_v32 }
 0x120   : > { %990 = vmatpush3.bf16.msra.mxu1 %v1049_v32 }
 0x121   : > { %991 = vmatprep.subr.bf16.mxu1 %v1050_v33 }
 0x124   : > { %992 = vmatpush3.bf16.msra.mxu1 %v1050_v33 }
 0x125   : > { %993 = vmatprep.subr.bf16.mxu1 %v1051_v34 }
 0x128   : > { %994 = vmatpush3.bf16.msra.mxu1 %v1051_v34 }
 0x129   : > { %995 = vmatprep.subr.bf16.mxu1 %v1052_v35 }
 0x12c   : > { %996 = vmatpush3.bf16.msra.mxu1 %v1052_v35 }
 0x1e2   : > { %v975_v37 = vpop.f32.mrb[0].mxu1 }
 0x1e3   : > { %v529_v38 = vadd.f32 %v975_v37, %v874_v36  ;;  %v520_v39 = vpop.f32.mrb[1].mxu1 }
 0x1e4   : > { %v521_v40 = vadd.f32 %v874_v36, %v520_v39  ;;  %v976_v41 = vpop.f32.mrb[2].mxu1 }
 0x1e5   : > { %v532_v42 = vadd.f32 %v976_v41, %v874_v36  ;;  %v523_v43 = vpop.f32.mrb[3].mxu1  ;;  %v553_v45 = vmax.f32 %v529_v38, 0.0 }
 0x1e6   : > { %v524_v44 = vadd.f32 %v874_v36, %v523_v43  ;;  %v551_v47 = vmax.f32 %v521_v40, 0.0 }
 0x1e7   : > { %v554_v46 = vmax.f32 %v532_v42, 0.0 }
 0x1e8   : > { %v552_v48 = vmax.f32 %v524_v44, 0.0 }
 0x1e9   : > { %v560_v49 = vpack.c.bf16 %v554_v46, %v553_v45 }
 0x1ea   : > { %v559_v50 = vpack.c.bf16 %v552_v48, %v551_v47  ;;  %v979_v51 = vpop.f32.mrb[4].mxu1 }
 0x1eb   : > { %v545_v52 = vadd.f32 %v979_v51, %v874_v36  ;;  %v536_v53 = vpop.f32.mrb[5].mxu1 }
 0x1ec   : > { %v537_v54 = vadd.f32 %v874_v36, %v536_v53  ;;  %v980_v55 = vpop.f32.mrb[6].mxu1  ;;  %997 = vmatprep.mubr.bf16.mxu1 %v559_v50 }
 0x1ed   : > { %v548_v56 = vadd.f32 %v980_v55, %v874_v36  ;;  %v539_v57 = vpop.f32.mrb[7].mxu1  ;;  %998 = vmatmul.mubr.bf16.vlgmr.msra.gmra.mrb[8].mxu1 %v560_v49  ;;  %v557_v59 = vmax.f32 %v545_v52, 0.0 }
 0x1ee   : > { %v540_v58 = vadd.f32 %v874_v36, %v539_v57  ;;  %v555_v61 = vmax.f32 %v537_v54, 0.0 }
 0x1ef   : > { %v558_v60 = vmax.f32 %v548_v56, 0.0 }
 0x1f0   : > { %v556_v62 = vmax.f32 %v540_v58, 0.0 }
 0x1f1   : > { %v562_v63 = vpack.c.bf16 %v558_v60, %v557_v59 }
 0x1f2   : > { %v561_v0 = vpack.c.bf16 %v556_v62, %v555_v61 }
 0x1f4   : > { %1001 = vmatprep.mubr.bf16.mxu1 %v561_v0 }
 0x1f5   : > { %1002 = vmatmul.mubr.bf16.gmra.mrb[12].mxu1 %v562_v63 }
 0x2c0   : > { %v999_v1 = vpop.f32.mrb[8].mxu1 }
 0x2c1   : > { %v662_v2 = vpop.f32.mrb[9].mxu1 }
 0x2c2   : > { %v1000_v3 = vpop.f32.mrb[10].mxu1 }
 0x2c3   : > { %v694_v4 = vpack.c.bf16 %v1000_v3, %v999_v1  ;;  %v665_v5 = vpop.f32.mrb[11].mxu1 }
 0x2c4   : > { %v693_v6 = vpack.c.bf16 %v665_v5, %v662_v2 }
 0x2c6   : > { %1005 = vmatprep.subr.bf16.mxu0 %v693_v6 }
 0x2c7   : > { %1006 = vmatpush3.bf16.msra.mxu0 %v693_v6 }
 0x2c8   : > { %v1003_v7 = vpop.f32.mrb[12].mxu1  ;;  %1007 = vmatprep.subr.bf16.mxu0 %v694_v4 }
 0x2c9   : > { %v678_v8 = vpop.f32.mrb[13].mxu1 }
 0x2ca   : > { %v1004_v9 = vpop.f32.mrb[14].mxu1 }
 0x2cb   : > { %v696_v10 = vpack.c.bf16 %v1004_v9, %v1003_v7  ;;  %v681_v11 = vpop.f32.mrb[15].mxu1  ;;  %1008 = vmatpush3.bf16.msra.mxu0 %v694_v4 }
 0x2cc   : > { %v695_v12 = vpack.c.bf16 %v681_v11, %v678_v8 }
 0x2ce   : > { %1009 = vmatprep.subr.bf16.mxu0 %v695_v12 }
 0x2cf   : > { %1010 = vmatpush3.bf16.msra.mxu0 %v695_v12 }
 0x2d0   : > { %1011 = vmatprep.subr.bf16.mxu0 %v696_v10 }
 0x2d3   : > { %1012 = vmatpush3.bf16.msra.mxu0 %v696_v10 }
 0x2d6   : > { %1014 = vmatmul.mubr.msk.bf16.vlgmr.msra.gmra.mrb[8].mxu0 %vm473_vm0, %v1146_v26 }
 0x2d7   : > { %1017 = vmatprep.mubr.msk.bf16.mxu0 %vm473_vm0, %v1149_v27 }
 0x2de   : > { %1018 = vmatmul.mubr.msk.bf16.gmra.mrb[12].mxu0 %vm473_vm0, %v1162_v30 }
 0x3a9   : > { %v1015_v14 = vpop.f32.mrb[8].mxu0 }
 0x3aa   : > { %v746_v15 = vadd.f32 %v1015_v14, %v891_v13  ;;  %v737_v16 = vpop.f32.mrb[9].mxu0 }
 0x3ab   : > { %v738_v17 = vadd.f32 %v891_v13, %v737_v16  ;;  %v1016_v18 = vpop.f32.mrb[10].mxu0 }
 0x3ac   : > { %v770_v19 = vmax.f32 %v746_v15, 0.0  ;;  %v749_v20 = vadd.f32 %v1016_v18, %v891_v13  ;;  %v740_v21 = vpop.f32.mrb[11].mxu0 }
 0x3ad   : > { %v768_v22 = vmax.f32 %v738_v17, 0.0  ;;  %v741_v23 = vadd.f32 %v891_v13, %v740_v21 }
 0x3ae   : > { %778 = vst [vmem:[%s271_s25 + $0x10] sm:$0xff] %v770_v19  ;;  %v771_v24 = vmax.f32 %v749_v20, 0.0 }
 0x3af   : > { %776 = vst [vmem:[%s271_s25] sm:$0xff] %v768_v22  ;;  %v769_v25 = vmax.f32 %v741_v23, 0.0 }
 0x3b0   : > { %779 = vst [vmem:[%s271_s25 + $0x18] sm:$0xff] %v771_v24 }
 0x3b1   : > { %777 = vst [vmem:[%s271_s25 + $0x8] sm:$0xff] %v769_v25  ;;  %v1019_v26 = vpop.f32.mrb[12].mxu0 }
 0x3b2   : > { %v762_v27 = vadd.f32 %v1019_v26, %v891_v13  ;;  %v753_v28 = vpop.f32.mrb[13].mxu0 }
 0x3b3   : > { %v754_v29 = vadd.f32 %v891_v13, %v753_v28  ;;  %v1020_v30 = vpop.f32.mrb[14].mxu0 }
 0x3b4   : > { %v774_v31 = vmax.f32 %v762_v27, 0.0  ;;  %v765_v32 = vadd.f32 %v1020_v30, %v891_v13  ;;  %v756_v33 = vpop.f32.mrb[15].mxu0 }
 0x3b5   : > { %v772_v34 = vmax.f32 %v754_v29, 0.0  ;;  %v757_v35 = vadd.f32 %v891_v13, %v756_v33 }
 0x3b6   : > { %782 = vst [vmem:[%s271_s25 + $0x30] sm:$0xff] %v774_v31  ;;  %v775_v36 = vmax.f32 %v765_v32, 0.0 }
 0x3b7   : > { %780 = vst [vmem:[%s271_s25 + $0x20] sm:$0xff] %v772_v34  ;;  %v773_v37 = vmax.f32 %v757_v35, 0.0 }
 0x3b8   : > { %783 = vst [vmem:[%s271_s25 + $0x38] sm:$0xff] %v775_v36 }
 0x3b9   : > { %781 = vst [vmem:[%s271_s25 + $0x28] sm:$0xff] %v773_v37 }
 0x3ba PF: > { %s16_s21 = sadd.s32 1, %s1059_s21  }
 0x3bb   : > { %p13_p4 = scmp.ge.s32.totalorder %s16_s21, 5  }
 0x3bd   :  { %15 = sbr.rel (!%p13_p4) target bundleno = 1 (0x1), region = 77 }

// kernel: premodel_forward.8
= control target key start
LH: loop header
LB: loop body
LE: loop exit
PB: predicated region body
PF: predicated region fallthrough
CT: control target
= control target key end

     0   :  { %vm25_vm0 = vcmask 1042432   ;;  %s187_s0 = inlined_call_operand.vmem [shape: f32[19,128], index: 0, kind: input, shape index: {}]   ;;  %s188_s1 = inlined_call_operand.vmem [shape: f32[19,128], index: 1, kind: input, shape index: {}]   ;;  %s189_s2 = inlined_call_operand.hbm [shape: f32[1,1], index: 2, kind: output, shape index: {}]  }
   0x1   :  { %v15_v0 = vld [vmem:[%s188_s1] sm:$0xff]  ;;  %v14_v2 = vld [vmem:[%s187_s0 + $0x10] sm:$0x7]  ;;  %v13_v6 = vld [vmem:[%s187_s0 + $0x8] sm:$0xff] }
   0x2   :  { %v12_v1 = vld [vmem:[%s187_s0] sm:$0xff]  ;;  %v38_v3 = vmul.f32 %v15_v0, %v15_v0  ;;  %v20_v5 = vmul.f32 %v14_v2, %v14_v2  ;;  %v17_v7 = vld [vmem:[%s188_s1 + $0x10] sm:$0x7] }
   0x3   :  { %v18_v4 = vmul.f32 %v12_v1, %v12_v1 }
   0x4   :  { %7 = vsyncpa [#allocation3], 0  ;;  %41 = vadd.xlane.f32.xlu1 %v38_v3  ;;  %v19_v8 = vmul.f32 %v13_v6, %v13_v6  ;;  %v26_v9 = vsel %vm25_vm0, %v20_v5, 0.0  ;;  %v40_v10 = vmul.f32 %v17_v7, %v17_v7  ;;  %v16_v11 = vld [vmem:[%s188_s1 + $0x8] sm:$0xff]  ;;  %s137_s0 = smov [#allocation2]   ;;  %vm84_vm1 = vcmask 0  }
   0x5   :  { %21 = vadd.xlane.f32.xlu0 %v18_v4  ;;  %v39_v12 = vmul.f32 %v16_v11, %v16_v11  ;;  %s92_s1 = sshll.u32 %s137_s0, 4  ;;  %s93_s1 = int_to_ptr.vmem [resolvable:$true] %s92_s1 }
   0x6   :  { %v45_v13 = vsel %vm25_vm0, %v40_v10, 0.0  ;;  %s113_s21 = scalar_lea.vmem %s93_s1, 16  ;;  %s117_s22 = scalar_lea.vmem %s93_s1, 32 }
   0x7   :  { %p114_p0 = scmp.ne.s32.totalorder %s93_s1, %s113_s21  ;;  %p118_p1 = scmp.lt.s32.totalorder %s93_s1, %s93_s1 }
   0x8   :  { %27 = vadd.xlane.f32.xlu1 %v26_v9  ;;  %p119_p2 = scmp.lt.s32.totalorder %s117_s22, %s113_s21 }
   0x9   :  { %23 = vadd.xlane.f32.xlu0 %v19_v8 }
   0xa   :  { %p120_p3 = por %p119_p2, %p118_p1 }
   0xc   :  { %46 = vadd.xlane.f32.xlu1 %v45_v13  ;;  %p121_p4 = pnand %p120_p3, %p114_p0 }
   0xd   :  { %43 = vadd.xlane.f32.xlu0 %v39_v12 }
  0x91   :  { %v42_v14 = vpop.xlane.xlu1 %41 }
  0x92   :  { %v22_v15 = vpop.xlane.xlu0 %21  ;;  %v48_v16 = vadd.f32 1e-12, %v42_v14 }
  0x93   :  { %v29_v17 = vadd.f32 1e-12, %v22_v15 }
  0x94   :  { %101 = vrsqrt.f32 %v48_v16 }
  0x95   :  { %103 = vrsqrt.f32 %v29_v17  ;;  %v28_v18 = vpop.xlane.xlu1 %27 }
  0x96   :  { %v24_v19 = vpop.xlane.xlu0 %23  ;;  %v31_v20 = vadd.f32 1e-12, %v28_v18 }
  0x97   :  { %v30_v21 = vadd.f32 1e-12, %v24_v19 }
  0x98   :  { %105 = vrsqrt.f32 %v31_v20 }
  0x99   :  { %v47_v22 = vpop.xlane.xlu1 %46  ;;  %107 = vrsqrt.f32 %v30_v21 }
  0x9a   :  { %v44_v23 = vpop.xlane.xlu0 %43  ;;  %v50_v24 = vadd.f32 1e-12, %v47_v22 }
  0x9b   :  { %v49_v25 = vadd.f32 1e-12, %v44_v23 }
  0x9c   :  { %109 = vrsqrt.f32 %v50_v24 }
  0x9d   :  { %111 = vrsqrt.f32 %v49_v25 }
  0x9e   :  { %v102_v26 = vpop.eup %101 }
  0x9f   :  { %v104_v27 = vpop.eup %103  ;;  %v54_v28 = vmul.f32 %v102_v26, %v15_v0 }
  0xa0   :  { %v35_v29 = vmul.f32 %v104_v27, %v12_v1 }
  0xa2   :  { %v57_v30 = vmul.f32 %v54_v28, %v35_v29  ;;  %v106_v31 = vpop.eup %105 }
  0xa3   :  { %v108_v32 = vpop.eup %107  ;;  %v37_v35 = vmul.f32 %v106_v31, %v14_v2 }
  0xa4   :  { %60 = vadd.xlane.f32.xlu0 %v57_v30  ;;  %v36_v37 = vmul.f32 %v108_v32, %v13_v6 }
  0xa6   :  { %v110_v33 = vpop.eup %109 }
  0xa7   :  { %v112_v34 = vpop.eup %111  ;;  %v56_v36 = vmul.f32 %v110_v33, %v17_v7 }
  0xa8   :  { %v55_v38 = vmul.f32 %v112_v34, %v16_v11 }
  0xa9   :  { %v59_v39 = vmul.f32 %v56_v36, %v37_v35 }
  0xaa   :  { %v58_v40 = vmul.f32 %v55_v38, %v36_v37 }
  0xab   :  { %v64_v41 = vsel %vm25_vm0, %v59_v39, 0.0 }
  0xac   :  { %62 = vadd.xlane.f32.xlu1 %v58_v40  ;;  %65 = vadd.xlane.f32.xlu0 %v64_v41 }
 0x131   :  { %v61_v42 = vpop.xlane.xlu0 %60 }
 0x132   :  { %v67_v43 = vsub.f32 1.0, %v61_v42 }
 0x134   :  { %v70_v48 = vmul.f32 %v67_v43, %v67_v43 }
 0x139   :  { %v63_v44 = vpop.xlane.xlu1 %62  ;;  %v66_v45 = vpop.xlane.xlu0 %65 }
 0x13a   :  { %v68_v46 = vsub.f32 1.0, %v63_v44  ;;  %v69_v47 = vsub.f32 1.0, %v66_v45 }
 0x13c   :  { %v71_v49 = vmul.f32 %v68_v46, %v68_v46  ;;  %v72_v50 = vmul.f32 %v69_v47, %v69_v47 }
 0x13e   :  { %v73_v51 = vadd.f32 %v71_v49, %v70_v48  ;;  %v74_v52 = vsel %vm25_vm0, %v72_v50, 0.0 }
 0x140   :  { %v75_v53 = vadd.f32 %v74_v52, %v73_v51 }
 0x142   :  { %v76_v54 = vrot.slane %v75_v53, 4 }
 0x144   :  { %v77_v55 = vadd.f32 %v76_v54, %v75_v53 }
 0x146   :  { %v78_v56 = vrot.slane %v77_v55, 2 }
 0x148   :  { %v79_v57 = vadd.f32 %v78_v56, %v77_v55 }
 0x14a   :  { %v80_v58 = vrot.slane %v79_v57, 1 }
 0x14c   :  { %v81_v59 = vadd.f32 %v80_v58, %v79_v57 }
 0x14e   :  { %v83_v60 = vmul.f32 0.05263158, %v81_v59 }
 0x150   :  { %85 = vst.msk [vmem:[#allocation2] sm:$0x1] %vm84_vm1, %v83_v60 }
 0x151   :  { %124 = shalt.err (!%p121_p4)
}
 0x152   :  { %s125_s25 = scalar_lea.hbm %s189_s2, 16 }
 0x153   :  { %p126_p5 = scmp.ne.s32.totalorder %s189_s2, %s125_s25  ;;  %p129_p6 = scmp.lt.u32.totalorder %s125_s25, %s189_s2 }
 0x155   :  { %p131_p7 = pnand %p129_p6, %p126_p5 }
 0x157   :  { %134 = shalt.err (!%p131_p7)
}
 0x158   :  { %95 = dma.vmem_to_hbm [thread:$0]  %s93_s1, 16, %s189_s2, [#allocation3]  }
 0x159   :  { %135 = dma.done.wait [#allocation3], 16  }
 0x15a   :  { %136 = vsyncadd [#allocation3], 4294967280 }
 0x15b   :  { %99 = vsyncpa [#allocation3], 1 }

</bundles_post_ra>
